<compile_context>
chip_gen: v7x
topology: tpu7x:2x2x1
jax: 0.10.0
libtpu: 0.0.40
codegen_flags: <defaults>
</compile_context>

<pallas_src>
import functools

import jax
import jax.numpy as jnp
from jax import lax
from jax.experimental import pallas as pl
from jax.experimental.pallas import tpu as pltpu

BN_EPS = 1e-5


# ----------------------------------------------------------------------------
# In-kernel helpers
# ----------------------------------------------------------------------------
def _row_im2col(x, c, w_px):
    """x: (H, W*c) f32 tile -> (H, 9*W*c) patches for a 3x3, pad=1 conv.

    Column layout: tap t = dy*3+dx occupies [t*W*c, (t+1)*W*c); within a tap the
    lane index is w*c + ci (output column w, input channel ci).  The zero halo is
    built in-kernel with concatenates (no HBM-padded copy of the activation).
    """
    h = x.shape[0]
    zl = jnp.zeros((h, c), x.dtype)
    xw = jnp.concatenate([zl, x, zl], axis=1)            # (H, (W+2)*c)
    zr = jnp.zeros((1, xw.shape[1]), x.dtype)
    xp = jnp.concatenate([zr, xw, zr], axis=0)           # (H+2, (W+2)*c)
    slabs = []
    for dy in range(3):
        for dx in range(3):
            slabs.append(xp[dy:dy + h, dx * c:dx * c + w_px * c])
    return jnp.concatenate(slabs, axis=1)                # (H, 9*W*c)


def _moments(y):
    # per-channel partial stats for train-mode BN (summed over H here; W and N
    # reductions are finished wrapper-side from the tiny (N, 2, W*Cout) output).
    return jnp.concatenate(
        [jnp.sum(y, axis=0, keepdims=True),
         jnp.sum(y * y, axis=0, keepdims=True)], axis=0)


# ----------------------------------------------------------------------------
# Kernels
# ----------------------------------------------------------------------------
def _conv_first_kernel(x1_ref, x2_ref, w_ref, b_ref, y_ref, mom_ref, *,
                       c1, c2, w_px):
    # x1_ref: (H, W*c1) upsampled low-res input,  x2_ref: (H, W*c2) skip input
    # w_ref : (9*W*(c1+c2), W*Cout) bf16, block-diag expanded, rows = [x1 taps | x2 taps]
    # b_ref : (1, W*Cout) f32 (bias tiled over W)
    # y_ref : (H, W*Cout) f32 = relu(conv3x3(cat(up(x1), x2)) + b)   (lane-dense)
    # mom_ref: (2, W*Cout) f32 partial [sum; sum of squares] over H for this batch element
    p1 = _row_im2col(x1_ref[...], c1, w_px)
    p2 = _row_im2col(x2_ref[...], c2, w_px)
    patches = jnp.concatenate([p1, p2], axis=1).astype(w_ref.dtype)
    acc = jnp.dot(patches, w_ref[...], preferred_element_type=jnp.float32)
    y = jnp.maximum(acc + b_ref[...], 0.0)
    y_ref[...] = y
    mom_ref[...] = _moments(y)


def _conv_next_kernel(x_ref, sc_ref, sh_ref, w_ref, b_ref, y_ref, mom_ref, *,
                      c_in, w_px):
    # Applies the previous layer's BatchNorm (per-channel scale/shift, lane-dense)
    # to the loaded tile, zero-pads in-kernel, then conv + bias + ReLU + moments.
    xn = x_ref[...] * sc_ref[...] + sh_ref[...]          # (H, W*c_in)
    patches = _row_im2col(xn, c_in, w_px).astype(w_ref.dtype)
    acc = jnp.dot(patches, w_ref[...], preferred_element_type=jnp.float32)
    y = jnp.maximum(acc + b_ref[...], 0.0)
    y_ref[...] = y
    mom_ref[...] = _moments(y)


def _scale_bias_kernel(x_ref, sc_ref, sh_ref, o_ref):
    # final BatchNorm application as a lane-dense scale/shift epilogue
    o_ref[...] = x_ref[...] * sc_ref[...] + sh_ref[...]


# ----------------------------------------------------------------------------
# pallas_call wrappers
# ----------------------------------------------------------------------------
def _conv_first(x1u, x2, w_big, b_wide, *, h, w_px, c1, c2, cout):
    n = x1u.shape[0]
    k = w_big.shape[0]
    wcout = w_px * cout
    kern = functools.partial(_conv_first_kernel, c1=c1, c2=c2, w_px=w_px)
    return pl.pallas_call(
        kern,
        out_shape=(jax.ShapeDtypeStruct((n, h, wcout), jnp.float32),
                   jax.ShapeDtypeStruct((n, 2, wcout), jnp.float32)),
        grid=(n,),
        in_specs=[
            pl.BlockSpec((None, h, w_px * c1), lambda i: (i, 0, 0)),
            pl.BlockSpec((None, h, w_px * c2), lambda i: (i, 0, 0)),
            pl.BlockSpec((k, wcout), lambda i: (0, 0)),
            pl.BlockSpec((1, wcout), lambda i: (0, 0)),
        ],
        out_specs=(
            pl.BlockSpec((None, h, wcout), lambda i: (i, 0, 0)),
            pl.BlockSpec((None, 2, wcout), lambda i: (i, 0, 0)),
        ),
        compiler_params=pltpu.CompilerParams(
            dimension_semantics=("parallel",)),
    )(x1u, x2, w_big, b_wide)


def _conv_next(x, sc_wide, sh_wide, w_big, b_wide, *, h, w_px, cin, cout):
    n = x.shape[0]
    k = w_big.shape[0]
    wcin = w_px * cin
    wcout = w_px * cout
    kern = functools.partial(_conv_next_kernel, c_in=cin, w_px=w_px)
    return pl.pallas_call(
        kern,
        out_shape=(jax.ShapeDtypeStruct((n, h, wcout), jnp.float32),
                   jax.ShapeDtypeStruct((n, 2, wcout), jnp.float32)),
        grid=(n,),
        in_specs=[
            pl.BlockSpec((None, h, wcin), lambda i: (i, 0, 0)),
            pl.BlockSpec((1, wcin), lambda i: (0, 0)),
            pl.BlockSpec((1, wcin), lambda i: (0, 0)),
            pl.BlockSpec((k, wcout), lambda i: (0, 0)),
            pl.BlockSpec((1, wcout), lambda i: (0, 0)),
        ],
        out_specs=(
            pl.BlockSpec((None, h, wcout), lambda i: (i, 0, 0)),
            pl.BlockSpec((None, 2, wcout), lambda i: (i, 0, 0)),
        ),
        compiler_params=pltpu.CompilerParams(
            dimension_semantics=("parallel",)),
    )(x, sc_wide, sh_wide, w_big, b_wide)


def _scale_bias(x, sc_wide, sh_wide):
    n, h, wc = x.shape
    return pl.pallas_call(
        _scale_bias_kernel,
        out_shape=jax.ShapeDtypeStruct((n, h, wc), jnp.float32),
        grid=(n,),
        in_specs=[
            pl.BlockSpec((None, h, wc), lambda i: (i, 0, 0)),
            pl.BlockSpec((1, wc), lambda i: (0, 0)),
            pl.BlockSpec((1, wc), lambda i: (0, 0)),
        ],
        out_specs=pl.BlockSpec((None, h, wc), lambda i: (i, 0, 0)),
        compiler_params=pltpu.CompilerParams(
            dimension_semantics=("parallel",)),
    )(x, sc_wide, sh_wide)


# ----------------------------------------------------------------------------
# Wrapper-side parameter prep (tiny, compile-time-fused by XLA)
# ----------------------------------------------------------------------------
def _expand_conv_weight(w, w_px):
    """(3,3,Cin,Cout) -> (9*W*Cin, W*Cout): per-tap kron(I_W, w_tap).

    Lets one lane-dense matmul (H, 9*W*Cin) @ (9*W*Cin, W*Cout) produce the conv
    output directly in the (H, W*Cout) layout -- no in-kernel relayout/reshape."""
    kh, kw, cin, cout = w.shape
    wt = w.reshape(kh * kw, cin, cout)
    eye = jnp.eye(w_px, dtype=w.dtype)
    big = jnp.einsum('ab,tio->taibo', eye, wt)           # (9, W, Cin, W, Cout)
    return big.reshape(kh * kw * w_px * cin, w_px * cout)


def _bn_affine(mom, gamma, beta, n, h, w_px, c):
    """Finish the moment reduction and return train-mode BN scale/shift (f32)."""
    m = mom.reshape(n, 2, w_px, c)
    cnt = n * h * w_px
    mean = jnp.sum(m[:, 0], axis=(0, 1)) / cnt
    var = jnp.sum(m[:, 1], axis=(0, 1)) / cnt - mean * mean   # biased var (train mode)
    scale = gamma * lax.rsqrt(var + BN_EPS)
    shift = beta - mean * scale
    return scale, shift


def _tile_c(v, w_px):
    return jnp.tile(v, w_px).reshape(1, w_px * v.shape[0])


# ----------------------------------------------------------------------------
# Module glue (parameter init + forward), mirroring Up(n, in_ch, out_ch)
# ----------------------------------------------------------------------------
def init_up_params(key, n, in_channels, out_channels):
    """Deterministic params for DoubleConvBlock (n=2) / TripleConvBlock (n=3)."""
    assert n in (2, 3)
    params = []
    cin = in_channels
    for _ in range(n):
        key, kw, kb = jax.random.split(key, 3)
        params.append(dict(
            w=0.1 * jax.random.normal(kw, (3, 3, cin, out_channels), jnp.float32),
            b=0.1 * jax.random.normal(kb, (out_channels,), jnp.float32),
            gamma=jnp.ones((out_channels,), jnp.float32),
            beta=jnp.zeros((out_channels,), jnp.float32),
        ))
        cin = out_channels
    return params


def up_forward(x1_nchw, x2_nchw, params):
    n, c1, h1, w1 = x1_nchw.shape
    _, c2, h, w_px = x2_nchw.shape

    # NCHW -> NHWC (layout plumbing only)
    x1 = jnp.transpose(x1_nchw, (0, 2, 3, 1))
    x2 = jnp.transpose(x2_nchw, (0, 2, 3, 1))
    # nn.Upsample(scale_factor=2, mode='nearest') on the low-res input
    x1u = jnp.repeat(jnp.repeat(x1, 2, axis=1), 2, axis=2)        # (N, H, W, C1)

    # lane-dense views for the kernels (free, row-major compatible reshapes)
    x1u = x1u.reshape(n, h, w_px * c1)
    x2l = x2.reshape(n, h, w_px * c2)

    # --- first ConvBlock: fused (concat + pad + conv + bias + ReLU + BN stats) ---
    p0 = params[0]
    cout = p0["w"].shape[-1]
    w_first = jnp.concatenate(
        [_expand_conv_weight(p0["w"][:, :, :c1, :], w_px),
         _expand_conv_weight(p0["w"][:, :, c1:, :], w_px)],
        axis=0).astype(jnp.bfloat16)
    b_wide = _tile_c(p0["b"], w_px)
    y, mom = _conv_first(x1u, x2l, w_first, b_wide,
                         h=h, w_px=w_px, c1=c1, c2=c2, cout=cout)
    scale, shift = _bn_affine(mom, p0["gamma"], p0["beta"], n, h, w_px, cout)

    # --- remaining ConvBlocks: previous BN is applied inside the conv kernel ---
    for p in params[1:]:
        cin, cout = p["w"].shape[2], p["w"].shape[3]
        w_big = _expand_conv_weight(p["w"], w_px).astype(jnp.bfloat16)
        b_wide = _tile_c(p["b"], w_px)
        sc_w = _tile_c(scale, w_px)
        sh_w = _tile_c(shift, w_px)
        y, mom = _conv_next(y, sc_w, sh_w, w_big, b_wide,
                            h=h, w_px=w_px, cin=cin, cout=cout)
        scale, shift = _bn_affine(mom, p["gamma"], p["beta"], n, h, w_px, cout)

    # --- final BatchNorm: tiny lane-dense scale/shift epilogue ---
    y = _scale_bias(y, _tile_c(scale, w_px), _tile_c(shift, w_px))

    y = y.reshape(n, h, w_px, cout)
    return jnp.transpose(y, (0, 3, 1, 2))                # back to NCHW


if __name__ == "__main__":
    key = jax.random.PRNGKey(0)
    k1, k2, kp = jax.random.split(key, 3)

    # Shapes consistent with Up(n=2, in_channels=8, out_channels=8):
    # x1 is the low-res feature map (upsampled 2x), x2 is the skip connection.
    N, C1, C2 = 2, 4, 4
    H1 = W1 = 8
    in_channels = C1 + C2
    out_channels = 8

    x1 = jax.random.normal(k1, (N, C1, H1, W1), jnp.float32)          # NCHW
    x2 = jax.random.normal(k2, (N, C2, 2 * H1, 2 * W1), jnp.float32)  # NCHW

    params = init_up_params(kp, n=2, in_channels=in_channels,
                            out_channels=out_channels)

    y = jax.jit(up_forward)(x1, x2, params)     # (N, out_channels, 16, 16) NCHW
    jax.block_until_ready(y)
    assert y.shape == (N, out_channels, 2 * H1, 2 * W1)
    print("KERNEL_OK")
</pallas_src>

<mosaic_0001>
module attributes {stable_mosaic.version = 11 : i64} {
  func.func @_conv_first_kernel(%arg0: i32, %arg1: memref<1x16x64xf32, #tpu.memory_space<vmem>>, %arg2: memref<1x16x64xf32, #tpu.memory_space<vmem>>, %arg3: memref<1152x128xbf16, #tpu.memory_space<vmem>>, %arg4: memref<1x128xf32, #tpu.memory_space<vmem>>, %arg5: memref<1x16x128xf32, #tpu.memory_space<vmem>>, %arg6: memref<1x2x128xf32, #tpu.memory_space<vmem>>) attributes {dimension_semantics = [#tpu.dimension_semantics<parallel>], iteration_bounds = array<i64: 2>, scalar_prefetch = 0 : i64, scratch_operands = 0 : i64, tpu.core_type = #tpu.core_type<tc>, window_params = [{transform_indices = @transform_0, window_bounds = array<i64: 1, 16, 64>}, {transform_indices = @transform_1, window_bounds = array<i64: 1, 16, 64>}, {pipeline_mode = #tpu.pipeline_mode<synchronous>, transform_indices = @transform_2, window_bounds = array<i64: 1152, 128>}, {pipeline_mode = #tpu.pipeline_mode<synchronous>, transform_indices = @transform_3, window_bounds = array<i64: 1, 128>}, {transform_indices = @transform_4, window_bounds = array<i64: 1, 16, 128>}, {transform_indices = @transform_5, window_bounds = array<i64: 1, 2, 128>}]} {
    %c0 = arith.constant 0 : index
    %c0_0 = arith.constant 0 : index
    %c0_1 = arith.constant 0 : index
    %0 = vector.load %arg1[%c0, %c0_0, %c0_1] : memref<1x16x64xf32, #tpu.memory_space<vmem>>, vector<1x16x64xf32>
    %1 = vector.shape_cast %0 : vector<1x16x64xf32> to vector<16x64xf32>
    %cst = arith.constant 0.000000e+00 : f32
    %2 = vector.broadcast %cst : f32 to vector<16x4xf32>
    %3 = tpu.concatenate %2, %1, %2 in 1 : vector<16x4xf32>, vector<16x64xf32>, vector<16x4xf32> -> vector<16x72xf32>
    %cst_2 = arith.constant 0.000000e+00 : f32
    %4 = vector.broadcast %cst_2 : f32 to vector<1x72xf32>
    %5 = tpu.concatenate %4, %3, %4 in 0 : vector<1x72xf32>, vector<16x72xf32>, vector<1x72xf32> -> vector<18x72xf32>
    %6 = vector.extract_strided_slice %5 {offsets = [0, 0], sizes = [16, 64], strides = [1, 1]} : vector<18x72xf32> to vector<16x64xf32>
    %7 = vector.extract_strided_slice %5 {offsets = [0, 4], sizes = [16, 64], strides = [1, 1]} : vector<18x72xf32> to vector<16x64xf32>
    %8 = vector.extract_strided_slice %5 {offsets = [0, 8], sizes = [16, 64], strides = [1, 1]} : vector<18x72xf32> to vector<16x64xf32>
    %9 = vector.extract_strided_slice %5 {offsets = [1, 0], sizes = [16, 64], strides = [1, 1]} : vector<18x72xf32> to vector<16x64xf32>
    %10 = vector.extract_strided_slice %5 {offsets = [1, 4], sizes = [16, 64], strides = [1, 1]} : vector<18x72xf32> to vector<16x64xf32>
    %11 = vector.extract_strided_slice %5 {offsets = [1, 8], sizes = [16, 64], strides = [1, 1]} : vector<18x72xf32> to vector<16x64xf32>
    %12 = vector.extract_strided_slice %5 {offsets = [2, 0], sizes = [16, 64], strides = [1, 1]} : vector<18x72xf32> to vector<16x64xf32>
    %13 = vector.extract_strided_slice %5 {offsets = [2, 4], sizes = [16, 64], strides = [1, 1]} : vector<18x72xf32> to vector<16x64xf32>
    %14 = vector.extract_strided_slice %5 {offsets = [2, 8], sizes = [16, 64], strides = [1, 1]} : vector<18x72xf32> to vector<16x64xf32>
    %15 = tpu.concatenate %6, %7, %8, %9, %10, %11, %12, %13, %14 in 1 : vector<16x64xf32>, vector<16x64xf32>, vector<16x64xf32>, vector<16x64xf32>, vector<16x64xf32>, vector<16x64xf32>, vector<16x64xf32>, vector<16x64xf32>, vector<16x64xf32> -> vector<16x576xf32>
    %c0_3 = arith.constant 0 : index
    %c0_4 = arith.constant 0 : index
    %c0_5 = arith.constant 0 : index
    %16 = vector.load %arg2[%c0_3, %c0_4, %c0_5] : memref<1x16x64xf32, #tpu.memory_space<vmem>>, vector<1x16x64xf32>
    %17 = vector.shape_cast %16 : vector<1x16x64xf32> to vector<16x64xf32>
    %cst_6 = arith.constant 0.000000e+00 : f32
    %18 = vector.broadcast %cst_6 : f32 to vector<16x4xf32>
    %19 = tpu.concatenate %18, %17, %18 in 1 : vector<16x4xf32>, vector<16x64xf32>, vector<16x4xf32> -> vector<16x72xf32>
    %cst_7 = arith.constant 0.000000e+00 : f32
    %20 = vector.broadcast %cst_7 : f32 to vector<1x72xf32>
    %21 = tpu.concatenate %20, %19, %20 in 0 : vector<1x72xf32>, vector<16x72xf32>, vector<1x72xf32> -> vector<18x72xf32>
    %22 = vector.extract_strided_slice %21 {offsets = [0, 0], sizes = [16, 64], strides = [1, 1]} : vector<18x72xf32> to vector<16x64xf32>
    %23 = vector.extract_strided_slice %21 {offsets = [0, 4], sizes = [16, 64], strides = [1, 1]} : vector<18x72xf32> to vector<16x64xf32>
    %24 = vector.extract_strided_slice %21 {offsets = [0, 8], sizes = [16, 64], strides = [1, 1]} : vector<18x72xf32> to vector<16x64xf32>
    %25 = vector.extract_strided_slice %21 {offsets = [1, 0], sizes = [16, 64], strides = [1, 1]} : vector<18x72xf32> to vector<16x64xf32>
    %26 = vector.extract_strided_slice %21 {offsets = [1, 4], sizes = [16, 64], strides = [1, 1]} : vector<18x72xf32> to vector<16x64xf32>
    %27 = vector.extract_strided_slice %21 {offsets = [1, 8], sizes = [16, 64], strides = [1, 1]} : vector<18x72xf32> to vector<16x64xf32>
    %28 = vector.extract_strided_slice %21 {offsets = [2, 0], sizes = [16, 64], strides = [1, 1]} : vector<18x72xf32> to vector<16x64xf32>
    %29 = vector.extract_strided_slice %21 {offsets = [2, 4], sizes = [16, 64], strides = [1, 1]} : vector<18x72xf32> to vector<16x64xf32>
    %30 = vector.extract_strided_slice %21 {offsets = [2, 8], sizes = [16, 64], strides = [1, 1]} : vector<18x72xf32> to vector<16x64xf32>
    %31 = tpu.concatenate %22, %23, %24, %25, %26, %27, %28, %29, %30 in 1 : vector<16x64xf32>, vector<16x64xf32>, vector<16x64xf32>, vector<16x64xf32>, vector<16x64xf32>, vector<16x64xf32>, vector<16x64xf32>, vector<16x64xf32>, vector<16x64xf32> -> vector<16x576xf32>
    %32 = tpu.concatenate %15, %31 in 1 : vector<16x576xf32>, vector<16x576xf32> -> vector<16x1152xf32>
    %33 = arith.truncf %32 : vector<16x1152xf32> to vector<16x1152xbf16>
    %c0_8 = arith.constant 0 : index
    %c0_9 = arith.constant 0 : index
    %34 = vector.load %arg3[%c0_8, %c0_9] : memref<1152x128xbf16, #tpu.memory_space<vmem>>, vector<1152x128xbf16>
    %cst_10 = arith.constant dense<0.000000e+00> : vector<16x128xf32>
    %35 = tpu.matmul %33, %34, %cst_10 {dimension_numbers = #tpu.dot_dimension_numbers<[1], [0], [0], [1], [0, 0, 1, 1], [], []>} : vector<16x1152xbf16>, vector<1152x128xbf16>, vector<16x128xf32> -> vector<16x128xf32>
    %c0_11 = arith.constant 0 : index
    %c0_12 = arith.constant 0 : index
    %36 = vector.load %arg4[%c0_11, %c0_12] : memref<1x128xf32, #tpu.memory_space<vmem>>, vector<1x128xf32>
    %37 = vector.broadcast %36 : vector<1x128xf32> to vector<16x128xf32>
    %38 = arith.addf %35, %37 : vector<16x128xf32>
    %cst_13 = arith.constant 0.000000e+00 : f32
    %39 = vector.broadcast %cst_13 : f32 to vector<16x128xf32>
    %40 = arith.maximumf %38, %39 : vector<16x128xf32>
    %c0_14 = arith.constant 0 : index
    %c0_15 = arith.constant 0 : index
    %c0_16 = arith.constant 0 : index
    %41 = vector.load %arg5[%c0_14, %c0_15, %c0_16] : memref<1x16x128xf32, #tpu.memory_space<vmem>>, vector<1x16x128xf32>
    %42 = vector.shape_cast %41 : vector<1x16x128xf32> to vector<16x128xf32>
    %43 = vector.shape_cast %40 : vector<16x128xf32> to vector<1x16x128xf32>
    tpu.vector_store %arg5[%c0_14, %c0_15, %c0_16], %43 {strides = array<i32>} : memref<1x16x128xf32, #tpu.memory_space<vmem>>, vector<1x16x128xf32>,
    %cst_17 = arith.constant dense<0.000000e+00> : vector<128xf32>
    %44 = vector.multi_reduction <add>, %40, %cst_17 [0] : vector<16x128xf32> to vector<128xf32>
    %45 = vector.shape_cast %44 : vector<128xf32> to vector<1x128xf32>
    %46 = arith.mulf %40, %40 : vector<16x128xf32>
    %cst_18 = arith.constant dense<0.000000e+00> : vector<128xf32>
    %47 = vector.multi_reduction <add>, %46, %cst_18 [0] : vector<16x128xf32> to vector<128xf32>
    %48 = vector.shape_cast %47 : vector<128xf32> to vector<1x128xf32>
    %49 = tpu.concatenate %45, %48 in 0 : vector<1x128xf32>, vector<1x128xf32> -> vector<2x128xf32>
    %c0_19 = arith.constant 0 : index
    %c0_20 = arith.constant 0 : index
    %c0_21 = arith.constant 0 : index
    %50 = vector.load %arg6[%c0_19, %c0_20, %c0_21] : memref<1x2x128xf32, #tpu.memory_space<vmem>>, vector<1x2x128xf32>
    %51 = vector.shape_cast %50 : vector<1x2x128xf32> to vector<2x128xf32>
    %52 = vector.shape_cast %49 : vector<2x128xf32> to vector<1x2x128xf32>
    tpu.vector_store %arg6[%c0_19, %c0_20, %c0_21], %52 {strides = array<i32>} : memref<1x2x128xf32, #tpu.memory_space<vmem>>, vector<1x2x128xf32>,
    return
  }
  func.func @transform_0(%arg0: i32) -> (i32, i32, i32) {
    %c0_i32 = arith.constant 0 : i32
    %c0_i32_0 = arith.constant 0 : i32
    %c0_i32_1 = arith.constant 0 : i32
    return %arg0, %c0_i32, %c0_i32_0 : i32, i32, i32
  }
  func.func @transform_1(%arg0: i32) -> (i32, i32, i32) {
    %c0_i32 = arith.constant 0 : i32
    %c0_i32_0 = arith.constant 0 : i32
    %c0_i32_1 = arith.constant 0 : i32
    return %arg0, %c0_i32, %c0_i32_0 : i32, i32, i32
  }
  func.func @transform_2(%arg0: i32) -> (i32, i32) {
    %c0_i32 = arith.constant 0 : i32
    %c0_i32_0 = arith.constant 0 : i32
    %c0_i32_1 = arith.constant 0 : i32
    return %c0_i32, %c0_i32_0 : i32, i32
  }
  func.func @transform_3(%arg0: i32) -> (i32, i32) {
    %c0_i32 = arith.constant 0 : i32
    %c0_i32_0 = arith.constant 0 : i32
    %c0_i32_1 = arith.constant 0 : i32
    return %c0_i32, %c0_i32_0 : i32, i32
  }
  func.func @transform_4(%arg0: i32) -> (i32, i32, i32) {
    %c0_i32 = arith.constant 0 : i32
    %c0_i32_0 = arith.constant 0 : i32
    %c0_i32_1 = arith.constant 0 : i32
    return %arg0, %c0_i32, %c0_i32_0 : i32, i32, i32
  }
  func.func @transform_5(%arg0: i32) -> (i32, i32, i32) {
    %c0_i32 = arith.constant 0 : i32
    %c0_i32_0 = arith.constant 0 : i32
    %c0_i32_1 = arith.constant 0 : i32
    return %arg0, %c0_i32, %c0_i32_0 : i32, i32, i32
  }
}

module attributes {stable_mosaic.version = 11 : i64} {
  func.func @_conv_next_kernel(%arg0: i32, %arg1: memref<1x16x128xf32, #tpu.memory_space<vmem>>, %arg2: memref<1x128xf32, #tpu.memory_space<vmem>>, %arg3: memref<1x128xf32, #tpu.memory_space<vmem>>, %arg4: memref<1152x128xbf16, #tpu.memory_space<vmem>>, %arg5: memref<1x128xf32, #tpu.memory_space<vmem>>, %arg6: memref<1x16x128xf32, #tpu.memory_space<vmem>>, %arg7: memref<1x2x128xf32, #tpu.memory_space<vmem>>) attributes {dimension_semantics = [#tpu.dimension_semantics<parallel>], iteration_bounds = array<i64: 2>, scalar_prefetch = 0 : i64, scratch_operands = 0 : i64, tpu.core_type = #tpu.core_type<tc>, window_params = [{transform_indices = @transform_0, window_bounds = array<i64: 1, 16, 128>}, {pipeline_mode = #tpu.pipeline_mode<synchronous>, transform_indices = @transform_1, window_bounds = array<i64: 1, 128>}, {pipeline_mode = #tpu.pipeline_mode<synchronous>, transform_indices = @transform_2, window_bounds = array<i64: 1, 128>}, {pipeline_mode = #tpu.pipeline_mode<synchronous>, transform_indices = @transform_3, window_bounds = array<i64: 1152, 128>}, {pipeline_mode = #tpu.pipeline_mode<synchronous>, transform_indices = @transform_4, window_bounds = array<i64: 1, 128>}, {transform_indices = @transform_5, window_bounds = array<i64: 1, 16, 128>}, {transform_indices = @transform_6, window_bounds = array<i64: 1, 2, 128>}]} {
    %c0 = arith.constant 0 : index
    %c0_0 = arith.constant 0 : index
    %c0_1 = arith.constant 0 : index
    %0 = vector.load %arg1[%c0, %c0_0, %c0_1] : memref<1x16x128xf32, #tpu.memory_space<vmem>>, vector<1x16x128xf32>
    %1 = vector.shape_cast %0 : vector<1x16x128xf32> to vector<16x128xf32>
    %c0_2 = arith.constant 0 : index
    %c0_3 = arith.constant 0 : index
    %2 = vector.load %arg2[%c0_2, %c0_3] : memref<1x128xf32, #tpu.memory_space<vmem>>, vector<1x128xf32>
    %3 = vector.broadcast %2 : vector<1x128xf32> to vector<16x128xf32>
    %4 = arith.mulf %1, %3 : vector<16x128xf32>
    %c0_4 = arith.constant 0 : index
    %c0_5 = arith.constant 0 : index
    %5 = vector.load %arg3[%c0_4, %c0_5] : memref<1x128xf32, #tpu.memory_space<vmem>>, vector<1x128xf32>
    %6 = vector.broadcast %5 : vector<1x128xf32> to vector<16x128xf32>
    %7 = arith.addf %4, %6 : vector<16x128xf32>
    %cst = arith.constant 0.000000e+00 : f32
    %8 = vector.broadcast %cst : f32 to vector<16x8xf32>
    %9 = tpu.concatenate %8, %7, %8 in 1 : vector<16x8xf32>, vector<16x128xf32>, vector<16x8xf32> -> vector<16x144xf32>
    %cst_6 = arith.constant 0.000000e+00 : f32
    %10 = vector.broadcast %cst_6 : f32 to vector<1x144xf32>
    %11 = tpu.concatenate %10, %9, %10 in 0 : vector<1x144xf32>, vector<16x144xf32>, vector<1x144xf32> -> vector<18x144xf32>
    %12 = vector.extract_strided_slice %11 {offsets = [0, 0], sizes = [16, 128], strides = [1, 1]} : vector<18x144xf32> to vector<16x128xf32>
    %13 = vector.extract_strided_slice %11 {offsets = [0, 8], sizes = [16, 128], strides = [1, 1]} : vector<18x144xf32> to vector<16x128xf32>
    %14 = vector.extract_strided_slice %11 {offsets = [0, 16], sizes = [16, 128], strides = [1, 1]} : vector<18x144xf32> to vector<16x128xf32>
    %15 = vector.extract_strided_slice %11 {offsets = [1, 0], sizes = [16, 128], strides = [1, 1]} : vector<18x144xf32> to vector<16x128xf32>
    %16 = vector.extract_strided_slice %11 {offsets = [1, 8], sizes = [16, 128], strides = [1, 1]} : vector<18x144xf32> to vector<16x128xf32>
    %17 = vector.extract_strided_slice %11 {offsets = [1, 16], sizes = [16, 128], strides = [1, 1]} : vector<18x144xf32> to vector<16x128xf32>
    %18 = vector.extract_strided_slice %11 {offsets = [2, 0], sizes = [16, 128], strides = [1, 1]} : vector<18x144xf32> to vector<16x128xf32>
    %19 = vector.extract_strided_slice %11 {offsets = [2, 8], sizes = [16, 128], strides = [1, 1]} : vector<18x144xf32> to vector<16x128xf32>
    %20 = vector.extract_strided_slice %11 {offsets = [2, 16], sizes = [16, 128], strides = [1, 1]} : vector<18x144xf32> to vector<16x128xf32>
    %21 = tpu.concatenate %12, %13, %14, %15, %16, %17, %18, %19, %20 in 1 : vector<16x128xf32>, vector<16x128xf32>, vector<16x128xf32>, vector<16x128xf32>, vector<16x128xf32>, vector<16x128xf32>, vector<16x128xf32>, vector<16x128xf32>, vector<16x128xf32> -> vector<16x1152xf32>
    %22 = arith.truncf %21 : vector<16x1152xf32> to vector<16x1152xbf16>
    %c0_7 = arith.constant 0 : index
    %c0_8 = arith.constant 0 : index
    %23 = vector.load %arg4[%c0_7, %c0_8] : memref<1152x128xbf16, #tpu.memory_space<vmem>>, vector<1152x128xbf16>
    %cst_9 = arith.constant dense<0.000000e+00> : vector<16x128xf32>
    %24 = tpu.matmul %22, %23, %cst_9 {dimension_numbers = #tpu.dot_dimension_numbers<[1], [0], [0], [1], [0, 0, 1, 1], [], []>} : vector<16x1152xbf16>, vector<1152x128xbf16>, vector<16x128xf32> -> vector<16x128xf32>
    %c0_10 = arith.constant 0 : index
    %c0_11 = arith.constant 0 : index
    %25 = vector.load %arg5[%c0_10, %c0_11] : memref<1x128xf32, #tpu.memory_space<vmem>>, vector<1x128xf32>
    %26 = vector.broadcast %25 : vector<1x128xf32> to vector<16x128xf32>
    %27 = arith.addf %24, %26 : vector<16x128xf32>
    %cst_12 = arith.constant 0.000000e+00 : f32
    %28 = vector.broadcast %cst_12 : f32 to vector<16x128xf32>
    %29 = arith.maximumf %27, %28 : vector<16x128xf32>
    %c0_13 = arith.constant 0 : index
    %c0_14 = arith.constant 0 : index
    %c0_15 = arith.constant 0 : index
    %30 = vector.load %arg6[%c0_13, %c0_14, %c0_15] : memref<1x16x128xf32, #tpu.memory_space<vmem>>, vector<1x16x128xf32>
    %31 = vector.shape_cast %30 : vector<1x16x128xf32> to vector<16x128xf32>
    %32 = vector.shape_cast %29 : vector<16x128xf32> to vector<1x16x128xf32>
    tpu.vector_store %arg6[%c0_13, %c0_14, %c0_15], %32 {strides = array<i32>} : memref<1x16x128xf32, #tpu.memory_space<vmem>>, vector<1x16x128xf32>,
    %cst_16 = arith.constant dense<0.000000e+00> : vector<128xf32>
    %33 = vector.multi_reduction <add>, %29, %cst_16 [0] : vector<16x128xf32> to vector<128xf32>
    %34 = vector.shape_cast %33 : vector<128xf32> to vector<1x128xf32>
    %35 = arith.mulf %29, %29 : vector<16x128xf32>
    %cst_17 = arith.constant dense<0.000000e+00> : vector<128xf32>
    %36 = vector.multi_reduction <add>, %35, %cst_17 [0] : vector<16x128xf32> to vector<128xf32>
    %37 = vector.shape_cast %36 : vector<128xf32> to vector<1x128xf32>
    %38 = tpu.concatenate %34, %37 in 0 : vector<1x128xf32>, vector<1x128xf32> -> vector<2x128xf32>
    %c0_18 = arith.constant 0 : index
    %c0_19 = arith.constant 0 : index
    %c0_20 = arith.constant 0 : index
    %39 = vector.load %arg7[%c0_18, %c0_19, %c0_20] : memref<1x2x128xf32, #tpu.memory_space<vmem>>, vector<1x2x128xf32>
    %40 = vector.shape_cast %39 : vector<1x2x128xf32> to vector<2x128xf32>
    %41 = vector.shape_cast %38 : vector<2x128xf32> to vector<1x2x128xf32>
    tpu.vector_store %arg7[%c0_18, %c0_19, %c0_20], %41 {strides = array<i32>} : memref<1x2x128xf32, #tpu.memory_space<vmem>>, vector<1x2x128xf32>,
    return
  }
  func.func @transform_0(%arg0: i32) -> (i32, i32, i32) {
    %c0_i32 = arith.constant 0 : i32
    %c0_i32_0 = arith.constant 0 : i32
    %c0_i32_1 = arith.constant 0 : i32
    return %arg0, %c0_i32, %c0_i32_0 : i32, i32, i32
  }
  func.func @transform_1(%arg0: i32) -> (i32, i32) {
    %c0_i32 = arith.constant 0 : i32
    %c0_i32_0 = arith.constant 0 : i32
    %c0_i32_1 = arith.constant 0 : i32
    return %c0_i32, %c0_i32_0 : i32, i32
  }
  func.func @transform_2(%arg0: i32) -> (i32, i32) {
    %c0_i32 = arith.constant 0 : i32
    %c0_i32_0 = arith.constant 0 : i32
    %c0_i32_1 = arith.constant 0 : i32
    return %c0_i32, %c0_i32_0 : i32, i32
  }
  func.func @transform_3(%arg0: i32) -> (i32, i32) {
    %c0_i32 = arith.constant 0 : i32
    %c0_i32_0 = arith.constant 0 : i32
    %c0_i32_1 = arith.constant 0 : i32
    return %c0_i32, %c0_i32_0 : i32, i32
  }
  func.func @transform_4(%arg0: i32) -> (i32, i32) {
    %c0_i32 = arith.constant 0 : i32
    %c0_i32_0 = arith.constant 0 : i32
    %c0_i32_1 = arith.constant 0 : i32
    return %c0_i32, %c0_i32_0 : i32, i32
  }
  func.func @transform_5(%arg0: i32) -> (i32, i32, i32) {
    %c0_i32 = arith.constant 0 : i32
    %c0_i32_0 = arith.constant 0 : i32
    %c0_i32_1 = arith.constant 0 : i32
    return %arg0, %c0_i32, %c0_i32_0 : i32, i32, i32
  }
  func.func @transform_6(%arg0: i32) -> (i32, i32, i32) {
    %c0_i32 = arith.constant 0 : i32
    %c0_i32_0 = arith.constant 0 : i32
    %c0_i32_1 = arith.constant 0 : i32
    return %arg0, %c0_i32, %c0_i32_0 : i32, i32, i32
  }
}

module attributes {stable_mosaic.version = 11 : i64} {
  func.func @_scale_bias_kernel(%arg0: i32, %arg1: memref<1x16x128xf32, #tpu.memory_space<vmem>>, %arg2: memref<1x128xf32, #tpu.memory_space<vmem>>, %arg3: memref<1x128xf32, #tpu.memory_space<vmem>>, %arg4: memref<1x16x128xf32, #tpu.memory_space<vmem>>) attributes {dimension_semantics = [#tpu.dimension_semantics<parallel>], iteration_bounds = array<i64: 2>, scalar_prefetch = 0 : i64, scratch_operands = 0 : i64, tpu.core_type = #tpu.core_type<tc>, window_params = [{transform_indices = @transform_0, window_bounds = array<i64: 1, 16, 128>}, {pipeline_mode = #tpu.pipeline_mode<synchronous>, transform_indices = @transform_1, window_bounds = array<i64: 1, 128>}, {pipeline_mode = #tpu.pipeline_mode<synchronous>, transform_indices = @transform_2, window_bounds = array<i64: 1, 128>}, {transform_indices = @transform_3, window_bounds = array<i64: 1, 16, 128>}]} {
    %c0 = arith.constant 0 : index
    %c0_0 = arith.constant 0 : index
    %c0_1 = arith.constant 0 : index
    %0 = vector.load %arg1[%c0, %c0_0, %c0_1] : memref<1x16x128xf32, #tpu.memory_space<vmem>>, vector<1x16x128xf32>
    %1 = vector.shape_cast %0 : vector<1x16x128xf32> to vector<16x128xf32>
    %c0_2 = arith.constant 0 : index
    %c0_3 = arith.constant 0 : index
    %2 = vector.load %arg2[%c0_2, %c0_3] : memref<1x128xf32, #tpu.memory_space<vmem>>, vector<1x128xf32>
    %3 = vector.broadcast %2 : vector<1x128xf32> to vector<16x128xf32>
    %4 = arith.mulf %1, %3 : vector<16x128xf32>
    %c0_4 = arith.constant 0 : index
    %c0_5 = arith.constant 0 : index
    %5 = vector.load %arg3[%c0_4, %c0_5] : memref<1x128xf32, #tpu.memory_space<vmem>>, vector<1x128xf32>
    %6 = vector.broadcast %5 : vector<1x128xf32> to vector<16x128xf32>
    %7 = arith.addf %4, %6 : vector<16x128xf32>
    %c0_6 = arith.constant 0 : index
    %c0_7 = arith.constant 0 : index
    %c0_8 = arith.constant 0 : index
    %8 = vector.load %arg4[%c0_6, %c0_7, %c0_8] : memref<1x16x128xf32, #tpu.memory_space<vmem>>, vector<1x16x128xf32>
    %9 = vector.shape_cast %8 : vector<1x16x128xf32> to vector<16x128xf32>
    %10 = vector.shape_cast %7 : vector<16x128xf32> to vector<1x16x128xf32>
    tpu.vector_store %arg4[%c0_6, %c0_7, %c0_8], %10 {strides = array<i32>} : memref<1x16x128xf32, #tpu.memory_space<vmem>>, vector<1x16x128xf32>,
    return
  }
  func.func @transform_0(%arg0: i32) -> (i32, i32, i32) {
    %c0_i32 = arith.constant 0 : i32
    %c0_i32_0 = arith.constant 0 : i32
    %c0_i32_1 = arith.constant 0 : i32
    return %arg0, %c0_i32, %c0_i32_0 : i32, i32, i32
  }
  func.func @transform_1(%arg0: i32) -> (i32, i32) {
    %c0_i32 = arith.constant 0 : i32
    %c0_i32_0 = arith.constant 0 : i32
    %c0_i32_1 = arith.constant 0 : i32
    return %c0_i32, %c0_i32_0 : i32, i32
  }
  func.func @transform_2(%arg0: i32) -> (i32, i32) {
    %c0_i32 = arith.constant 0 : i32
    %c0_i32_0 = arith.constant 0 : i32
    %c0_i32_1 = arith.constant 0 : i32
    return %c0_i32, %c0_i32_0 : i32, i32
  }
  func.func @transform_3(%arg0: i32) -> (i32, i32, i32) {
    %c0_i32 = arith.constant 0 : i32
    %c0_i32_0 = arith.constant 0 : i32
    %c0_i32_1 = arith.constant 0 : i32
    return %arg0, %c0_i32, %c0_i32_0 : i32, i32, i32
  }
}

</mosaic_0001>

<bundles_post_ra>
// kernel: tile.33
= control target key start
LH: loop header
LB: loop body
LE: loop exit
PB: predicated region body
PF: predicated region fallthrough
CT: control target
= control target key end

     0   :  { %s28_s0 = inlined_call_operand.vmem [shape: f32[8], index: 0, kind: input, shape index: {}]   ;;  %s29_s1 = inlined_call_operand.vmem [shape: f32[16,8], index: 1, kind: output, shape index: {}]  }
   0x1   :  { %v4_v0 = vld [vmem:[%s28_s0] ss:$0 sm:$0xff] }
   0x2   :  { %5 = vst [vmem:[%s29_s1] sm:$0xff] %v4_v0  ;;  %8 = vst [vmem:[%s29_s1 + $0x8] sm:$0xff] %v4_v0 }

// kernel: tile.34
= control target key start
LH: loop header
LB: loop body
LE: loop exit
PB: predicated region body
PF: predicated region fallthrough
CT: control target
= control target key end

     0   :  { %s131_s10 = smov 120   ;;  %s132_s11 = smov 104   ;;  %vm3_vm0 = vcmask 64512   ;;  %vm9_vm1 = vcmask 1048512   ;;  %vm15_vm2 = vcmask 982912   ;;  %vm21_vm3 = vcmask 917312   ;;  %s207_s0 = inlined_call_operand.vmem [shape: f32[16,8], index: 0, kind: input, shape index: {}]   ;;  %s208_s1 = inlined_call_operand.vmem [shape: f32[1,128], index: 1, kind: output, shape index: {}]  }
   0x1   :  { %v101_v0 = vld [vmem:[%s207_s0 + $0xf] sm:$0x1]   ;;  %v103_v1 = vld [vmem:[%s207_s0 + $0xd] sm:$0x1]   ;;  %v102_v2 = vld [vmem:[%s207_s0 + $0xe] sm:$0x1]  }
   0x2   :  { %7 = vrot.lane.b32.xlu0 %v101_v0, %s131_s10  ;;  %19 = vrot.lane.b32.xlu1 %v103_v1, %s132_s11  ;;  %v104_v3 = vld [vmem:[%s207_s0 + $0xc] sm:$0x1]   ;;  %s133_s16 = smov 112   ;;  %s134_s17 = smov 96   ;;  %v105_v4 = vld [vmem:[%s207_s0 + $0xb] sm:$0x1]  }
   0x3   :  { %v106_v5 = vld [vmem:[%s207_s0 + $0xa] sm:$0x1]   ;;  %v2_v6 = vld [vmem:[%s207_s0] sm:$0x1]   ;;  %s135_s24 = smov 88   ;;  %s136_s25 = smov 80  }
   0x4   :  { %4 = vst.msk [vmem:[#allocation0] sm:$0x1] %vm3_vm0, %v2_v6   ;;  %v107_v7 = vld [vmem:[%s207_s0 + $0x9] sm:$0x1]   ;;  %v108_v8 = vld [vmem:[%s207_s0 + $0x8] sm:$0x1]  }
   0x5   :  { %s137_s30 = smov 72   ;;  %s138_s2 = smov 64   ;;  %v109_v9 = vld [vmem:[%s207_s0 + $0x7] sm:$0x1]   ;;  %v110_v10 = vld [vmem:[%s207_s0 + $0x6] sm:$0x1]  }
   0x6   :  { %13 = vrot.lane.b32.xlu0 %v102_v2, %s133_s16  ;;  %25 = vrot.lane.b32.xlu1 %v104_v3, %s134_s17  ;;  %s139_s7 = smov 56   ;;  %s140_s8 = smov 48   ;;  %v111_v11 = vld [vmem:[%s207_s0 + $0x5] sm:$0x1]   ;;  %v112_v12 = vld [vmem:[%s207_s0 + $0x4] sm:$0x1]  }
   0x7   :  { %s141_s13 = smov 40   ;;  %s142_s14 = smov 32   ;;  %v113_v13 = vld [vmem:[%s207_s0 + $0x3] sm:$0x1]   ;;  %v114_v14 = vld [vmem:[%s207_s0 + $0x2] sm:$0x1]  }
   0x8   :  { %s143_s19 = smov 24   ;;  %s144_s20 = smov 16   ;;  %v115_v15 = vld [vmem:[%s207_s0 + $0x1] sm:$0x1]   ;;  %vm27_vm4 = vcmask 851712   ;;  %vm33_vm5 = vcmask 786112  }
   0x9   :  { %s145_s0 = smov 8   ;;  %vm39_vm6 = vcmask 720512   ;;  %vm45_vm7 = vcmask 654912   ;;  %vm51_vm8 = vcmask 589312   ;;  %vm57_vm9 = vcmask 523712  }
   0xa   :  { %31 = vrot.lane.b32.xlu0 %v105_v4, %s135_s24  ;;  %37 = vrot.lane.b32.xlu1 %v106_v5, %s136_s25  ;;  %vm63_vm10 = vcmask 458112   ;;  %vm69_vm11 = vcmask 392512   ;;  %vm75_vm12 = vcmask 326912   ;;  %vm81_vm13 = vcmask 261312  }
   0xb   :  { %vm87_vm14 = vcmask 195712   ;;  %vm93_vm15 = vcmask 130112  }
   0xe   :  { %43 = vrot.lane.b32.xlu0 %v107_v7, %s137_s30  ;;  %49 = vrot.lane.b32.xlu1 %v108_v8, %s138_s2 }
  0x12   :  { %55 = vrot.lane.b32.xlu0 %v109_v9, %s139_s7  ;;  %61 = vrot.lane.b32.xlu1 %v110_v10, %s140_s8 }
  0x16   :  { %67 = vrot.lane.b32.xlu0 %v111_v11, %s141_s13  ;;  %73 = vrot.lane.b32.xlu1 %v112_v12, %s142_s14 }
  0x1a   :  { %79 = vrot.lane.b32.xlu0 %v113_v13, %s143_s19  ;;  %85 = vrot.lane.b32.xlu1 %v114_v14, %s144_s20 }
  0x1e   :  { %91 = vrot.lane.b32.xlu0 %v115_v15, %s145_s0 }
  0x74   :  { %v8_v16 = vpop.permute.xlu0 %7   ;;  %v20_v17 = vpop.permute.xlu1 %19  }
  0x75   :  { %10 = vst.msk [vmem:[#allocation0] sm:$0x1] %vm9_vm1, %v8_v16  }
  0x78   :  { %v14_v18 = vpop.permute.xlu0 %13   ;;  %v26_v19 = vpop.permute.xlu1 %25  }
  0x79   :  { %16 = vst.msk [vmem:[#allocation0] sm:$0x1] %vm15_vm2, %v14_v18  }
  0x7a   :  { %22 = vst.msk [vmem:[#allocation0] sm:$0x1] %vm21_vm3, %v20_v17  }
  0x7b   :  { %28 = vst.msk [vmem:[#allocation0] sm:$0x1] %vm27_vm4, %v26_v19  }
  0x7c   :  { %v32_v20 = vpop.permute.xlu0 %31   ;;  %v38_v21 = vpop.permute.xlu1 %37  }
  0x7d   :  { %34 = vst.msk [vmem:[#allocation0] sm:$0x1] %vm33_vm5, %v32_v20  }
  0x7e   :  { %40 = vst.msk [vmem:[#allocation0] sm:$0x1] %vm39_vm6, %v38_v21  }
  0x80   :  { %v44_v22 = vpop.permute.xlu0 %43   ;;  %v50_v23 = vpop.permute.xlu1 %49  }
  0x81   :  { %46 = vst.msk [vmem:[#allocation0] sm:$0x1] %vm45_vm7, %v44_v22  }
  0x82   :  { %52 = vst.msk [vmem:[#allocation0] sm:$0x1] %vm51_vm8, %v50_v23  }
  0x84   :  { %v56_v24 = vpop.permute.xlu0 %55   ;;  %v62_v25 = vpop.permute.xlu1 %61  }
  0x85   :  { %58 = vst.msk [vmem:[#allocation0] sm:$0x1] %vm57_vm9, %v56_v24  }
  0x86   :  { %64 = vst.msk [vmem:[#allocation0] sm:$0x1] %vm63_vm10, %v62_v25  }
  0x88   :  { %v68_v26 = vpop.permute.xlu0 %67   ;;  %v74_v27 = vpop.permute.xlu1 %73  }
  0x89   :  { %70 = vst.msk [vmem:[#allocation0] sm:$0x1] %vm69_vm11, %v68_v26  }
  0x8a   :  { %76 = vst.msk [vmem:[#allocation0] sm:$0x1] %vm75_vm12, %v74_v27  }
  0x8c   :  { %v80_v28 = vpop.permute.xlu0 %79   ;;  %v86_v29 = vpop.permute.xlu1 %85  }
  0x8d   :  { %82 = vst.msk [vmem:[#allocation0] sm:$0x1] %vm81_vm13, %v80_v28  }
  0x8e   :  { %88 = vst.msk [vmem:[#allocation0] sm:$0x1] %vm87_vm14, %v86_v29  }
  0x90   :  { %v92_v30 = vpop.permute.xlu0 %91  }
  0x91   :  { %94 = vst.msk [vmem:[#allocation0] sm:$0x1] %vm93_vm15, %v92_v30  }
  0x98   :  { %v98_v31 = vld [vmem:[#allocation0] sm:$0x1] }
  0x99   :  { %100 = vst [vmem:[%s208_s1] sm:$0x1] %v98_v31 }

// kernel: up_forward.3
= control target key start
LH: loop header
LB: loop body
LE: loop exit
PB: predicated region body
PF: predicated region fallthrough
CT: control target
= control target key end

     0   :  { %s1848_s18 = smov 0   ;;  %s2205_s0 = inlined_call_operand.vmem [shape: f32[2,16,64], index: 0, kind: input, shape index: {}]   ;;  %s2206_s1 = inlined_call_operand.vmem [shape: f32[2,16,64], index: 1, kind: input, shape index: {}]   ;;  %s2207_s2 = inlined_call_operand.vmem [shape: bf16[1152,128], index: 2, kind: input, shape index: {}]   ;;  %s2208_s3 = inlined_call_operand.vmem [shape: f32[1,128], index: 3, kind: input, shape index: {}]   ;;  %s2209_s4 = inlined_call_operand.vmem [shape: f32[2,16,128], index: 4, kind: output, shape index: {0}]   ;;  %s2210_s5 = inlined_call_operand.vmem [shape: f32[2,2,128], index: 5, kind: output, shape index: {1}]  }
   0x1 LB: > { %s1402_s19 = sadd.s32 4294967295, %s1808_s18   ;;  %p1406_p0 = scmp.ge.s32.totalorder %s1808_s18, 1  ;;  %s1808_s18 = sphi %s1848_s18, %s16_s18  }
   0x2   : > { %p200_p1 = scmp.lt.s32.totalorder %s1808_s18, 3 }
   0x4   : > { %p201_p2 = pnand %p1406_p0, %p200_p1 }
   0x5   : > { %p237_p3 = scmp.lt.s32.totalorder (!%p201_p2), %s1402_s19, 1  ;;  %s1810_s27 = smov (!%p201_p2), 4   ;;  %v1730_v6 = vld [vmem:[%s2207_s2 + $0x40] sm:$0xff] (!%p201_p2)   ;;  %v1732_v8 = vld [vmem:[%s2207_s2 + $0x48] sm:$0xff] (!%p201_p2)   ;;  %v1735_v11 = vld [vmem:[%s2207_s2 + $0x50] sm:$0xff] (!%p201_p2)   ;;  %vm267_vm0 = vcmask (!%p201_p2), 31744  }
   0x6   : > { %204 = sbr.rel (%p201_p2) target bundleno = 660 (0x294), region = 36  ;;  %v1731_v7 = vld [vmem:[%s2207_s2] sm:$0xff] (!%p201_p2)   ;;  %v1733_v9 = vld [vmem:[%s2207_s2 + $0x8] sm:$0xff] (!%p201_p2)   ;;  %1492 = vmatprep.subr.bf16.mxu0 (!%p201_p2), %v1730_v6  ;;  %v1737_v13 = vld [vmem:[%s2207_s2 + $0x10] sm:$0xff] (!%p201_p2)   ;;  %vm270_vm1 = vcmask (!%p201_p2), 556032   ;;  %vm275_vm2 = vcmask (!%p201_p2), 1040384  }
   0x7   : > { %v1734_v10 = vld [vmem:[%s2207_s2 + $0xc0] sm:$0xff] (!%p201_p2)   ;;  %1493 = vmatpush3.bf16.msra.mxu0 (!%p201_p2), %v1731_v7  ;;  %v1738_v14 = vld [vmem:[%s2207_s2 + $0xc8] sm:$0xff] (!%p201_p2)   ;;  %v1739_v15 = vld [vmem:[%s2207_s2 + $0x58] sm:$0xff] (!%p201_p2)   ;;  %vm298_vm3 = vcmask (!%p201_p2), 1046528   ;;  %s1812_s8 = smov (!%p201_p2), 64   ;;  %s1813_s11 = smov (!%p201_p2), 120  }
   0x8   : > { %v1736_v12 = vld [vmem:[%s2207_s2 + $0x80] sm:$0xff] (!%p201_p2)   ;;  %1514 = vmatprep.subr.bf16.mxu1 (!%p201_p2), %v1734_v10  ;;  %1494 = vmatprep.subr.bf16.mxu0 (!%p201_p2), %v1732_v8  ;;  %v1740_v16 = vld [vmem:[%s2207_s2 + $0x88] sm:$0xff] (!%p201_p2)   ;;  %v1741_v20 = vld [vmem:[%s2207_s2 + $0x18] sm:$0xff] (!%p201_p2)   ;;  %vm322_vm4 = vcmask (!%p201_p2), 1045504   ;;  %s1814_s21 = smov (!%p201_p2), 124   ;;  %vm342_vm5 = vcmask (!%p201_p2), 523264  }
   0x9   : > { %1515 = vmatpush3.bf16.msra.mxu1 (!%p201_p2), %v1736_v12  ;;  %v1742_v23 = vld [vmem:[%s2207_s2 + $0xd0] sm:$0xff] (!%p201_p2)   ;;  %v1743_v24 = vld [vmem:[%s2207_s2 + $0x60] sm:$0xff] (!%p201_p2)   ;;  %v1746_v38 = vld [vmem:[%s2207_s2 + $0xd8] sm:$0xff] (!%p201_p2)   ;;  %vm1817_vm6 = vmmov (!%p201_p2), 0  }
   0xa   : > { %1516 = vmatprep.subr.bf16.mxu1 (!%p201_p2), %v1738_v14  ;;  %v1744_v25 = vld [vmem:[%s2207_s2 + $0x90] sm:$0xff] (!%p201_p2)   ;;  %v1745_v33 = vld [vmem:[%s2207_s2 + $0x20] sm:$0xff] (!%p201_p2)   ;;  %v1747_v42 = vld [vmem:[%s2207_s2 + $0x68] sm:$0xff] (!%p201_p2)  }
   0xb   : > { %1495 = vmatpush3.bf16.msra.mxu0 (!%p201_p2), %v1733_v9  ;;  %v1748_v43 = vld [vmem:[%s2207_s2 + $0x98] sm:$0xff] (!%p201_p2)   ;;  %v1749_v50 = vld [vmem:[%s2207_s2 + $0x28] sm:$0xff] (!%p201_p2)   ;;  %v1750_v51 = vld [vmem:[%s2207_s2 + $0xe0] sm:$0xff] (!%p201_p2)  }
   0xc   : > { %1496 = vmatprep.subr.bf16.mxu0 (!%p201_p2), %v1735_v11  ;;  %v1751_v56 = vld [vmem:[%s2207_s2 + $0x70] sm:$0xff] (!%p201_p2)   ;;  %v1752_v57 = vld [vmem:[%s2207_s2 + $0xa0] sm:$0xff] (!%p201_p2)   ;;  %v1757_v7 = vld [vmem:[%s2207_s2 + $0x38] sm:$0xff] (!%p201_p2)  }
   0xd   : > { %s2212_s19 = smov (!%p237_p3, %s1402_s19), 1  ;;  %1517 = vmatpush3.bf16.msra.mxu1 %v1740_v16  ;;  %v1753_v60 = vld [vmem:[%s2207_s2 + $0x30] sm:$0xff]  }
   0xe   : > { %s1859_s20 = sshll.u32 %s2212_s19, 4  ;;  %1518 = vmatprep.subr.bf16.mxu1 %v1742_v23  ;;  %v1759_v16 = vld [vmem:[%s2207_s2 + $0xb0] sm:$0xff]  }
   0xf   : > { %s246_s23 = scalar_lea.vmem %s2206_s1, %s1859_s20  ;;  %s241_s26 = scalar_lea.vmem %s2205_s0, %s1859_s20  ;;  %1497 = vmatpush3.bf16.msra.mxu0 %v1737_v13 }
  0x10   : > { %v351_v0 = vld [vmem:[%s246_s23] sm:$0xff]  ;;  %v352_v1 = vld [vmem:[%s246_s23 + $0x8] sm:$0xff]  ;;  %1498 = vmatprep.subr.bf16.mxu0 %v1739_v15  ;;  %v1758_v15 = vld [vmem:[%s2207_s2 + $0xf0] sm:$0xff]   ;;  %s251_s28 = scalar_lea.vmem %s2209_s4, %s1859_s20  ;;  %s1413_s20 = sshll.u32 %s2212_s19, 1 }
  0x11   : > { %v1625_v2 = vpack.i.bf16 %v352_v1, %v351_v0  ;;  %v257_v3 = vld [vmem:[%s241_s26] sm:$0xff]  ;;  %v258_v4 = vld [vmem:[%s241_s26 + $0x8] sm:$0xff]  ;;  %1519 = vmatpush3.bf16.msra.mxu1 %v1744_v25  ;;  %s1811_s26 = smov 60   ;;  %s255_s6 = scalar_lea.vmem %s2210_s5, %s1413_s20 }
  0x12   : > { %v1630_v5 = vpack.i.bf16 %v258_v4, %v257_v3  ;;  %1520 = vmatprep.subr.bf16.mxu1 %v1746_v38  ;;  %v1754_v1 = vld [vmem:[%s2207_s2 + $0xe8] sm:$0xff]   ;;  %v1766_v25 = vld [vmem:[%s2207_s2 + $0x1c0] sm:$0xff]  }
  0x13   : > { %1626 = vrot.lane.b32.xlu0 %v1625_v2, %s1810_s27  ;;  %1499 = vmatpush3.bf16.msra.mxu0 %v1741_v20  ;;  %v1755_v2 = vld [vmem:[%s2207_s2 + $0x78] sm:$0xff]   ;;  %v1756_v3 = vld [vmem:[%s2207_s2 + $0xa8] sm:$0xff]  }
  0x14   : > { %1500 = vmatprep.subr.bf16.mxu0 %v1743_v24  ;;  %v1762_v24 = vld [vmem:[%s2207_s2 + $0x140] sm:$0xff]  }
  0x15   : > { %1521 = vmatpush3.bf16.msra.mxu1 %v1748_v43 }
  0x16   : > { %1522 = vmatprep.subr.bf16.mxu1 %v1750_v51 }
  0x17   : > { %1631 = vrot.lane.b32.xlu0 %v1630_v5, %s1810_s27  ;;  %1501 = vmatpush3.bf16.msra.mxu0 %v1745_v33  ;;  %s1815_s27 = smov 56  }
  0x18   : > { %1502 = vmatprep.subr.bf16.mxu0 %v1747_v42 }
  0x19   : > { %1523 = vmatpush3.bf16.msra.mxu1 %v1752_v57 }
  0x1a   : > { %1524 = vmatprep.subr.bf16.mxu1 %v1754_v1 }
  0x1b   : > { %1503 = vmatpush3.bf16.msra.mxu0 %v1749_v50 }
  0x1c   : > { %1504 = vmatprep.subr.bf16.mxu0 %v1751_v56 }
  0x1d   : > { %1525 = vmatpush3.bf16.msra.mxu1 %v1756_v3 }
  0x1e   : > { %1526 = vmatprep.subr.bf16.mxu1 %v1758_v15 }
  0x1f   : > { %1505 = vmatpush3.bf16.msra.mxu0 %v1753_v60 }
  0x20   : > { %1506 = vmatprep.subr.bf16.mxu0 %v1755_v2 }
  0x21   : > { %1527 = vmatpush3.bf16.msra.mxu1 %v1759_v16 }
  0x23   : > { %1507 = vmatpush3.bf16.msra.mxu0 %v1757_v7 }
  0x24   : > { %1536 = vmatprep.subr.bf16.mxu0 %v1762_v24 }
  0x85   : > { %v1627_v17 = vpop.permute.xlu0 %1626 }
  0x86   : > { %v1629_v18 = vunpack.i.h.bf16 %v1627_v17  ;;  %v1628_v19 = vunpack.i.l.bf16 %v1627_v17 }
  0x88   : > { %v362_v21 = vsel %vm267_vm0, 0.0, %v1629_v18  ;;  %v361_v22 = vsel %vm267_vm0, 0.0, %v1628_v19  ;;  %v1760_v18 = vld [vmem:[%s2207_s2 + $0xf8] sm:$0xff]  }
  0x89   : > { %v364_v26 = vsel %vm270_vm1, %v362_v21, 0.0  ;;  %v363_v27 = vsel %vm270_vm1, %v361_v22, 0.0  ;;  %v1632_v28 = vpop.permute.xlu0 %1631  ;;  %v1761_v22 = vld [vmem:[%s2207_s2 + $0xb8] sm:$0xff]   ;;  %1528 = vmatprep.subr.bf16.mxu1 %v1760_v18 }
  0x8a   : > { %v368_v29 = vrot.slane %v364_v26, 7  ;;  %v367_v30 = vrot.slane %v363_v27, 7  ;;  %v1634_v31 = vunpack.i.h.bf16 %v1632_v28  ;;  %v1633_v32 = vunpack.i.l.bf16 %v1632_v28  ;;  %1529 = vmatpush3.bf16.msra.mxu1 %v1761_v22  ;;  %v1765_v22 = vld [vmem:[%s2207_s2 + $0x108] sm:$0xff]  }
  0x8b   : > { %1558 = vmatprep.subr.bf16.mxu1 %v1766_v25 }
  0x8c   : > { %v374_v34 = vsel %vm275_vm2, %v368_v29, 0.0  ;;  %v1923_v35 = vsel %vm275_vm2, 0.0, %v367_v30  ;;  %v269_v36 = vsel %vm267_vm0, 0.0, %v1634_v31  ;;  %v268_v37 = vsel %vm267_vm0, 0.0, %v1633_v32 }
  0x8d   : > { %v392_v39 = vrot.slane %v374_v34, 1  ;;  %v272_v40 = vsel %vm270_vm1, %v269_v36, 0.0  ;;  %v271_v41 = vsel %vm270_vm1, %v268_v37, 0.0  ;;  %v1939_v46 = vsel %vm275_vm2, %v367_v30, %v368_v29 }
  0x8e   : > { %v277_v44 = vrot.slane %v272_v40, 7  ;;  %v276_v45 = vrot.slane %v271_v41, 7  ;;  %v389_v47 = vrot.slane %v1923_v35, 1  ;;  %v1635_v48 = vpack.i.bf16 %v1939_v46, %v1923_v35 }
  0x8f   : > { %v390_v49 = vrot.slane %v1939_v46, 1  ;;  %v415_v61 = vrot.slane %v374_v34, 2  ;;  %v412_v63 = vrot.slane %v1923_v35, 2  ;;  %v413_v0 = vrot.slane %v1939_v46, 2 }
  0x90   : > { %v1952_v52 = vsel %vm275_vm2, %v276_v45, %v277_v44  ;;  %v1955_v53 = vsel %vm275_vm2, 0.0, %v276_v45  ;;  %1636 = vrot.lane.b32.xlu1 %v1635_v48, %s1811_s26  ;;  %v283_v59 = vsel %vm275_vm2, %v277_v44, 0.0 }
  0x91   : > { %v391_v54 = vsel %vm298_vm3, %v389_v47, %v390_v49  ;;  %v393_v55 = vsel %vm298_vm3, %v390_v49, %v392_v39  ;;  %v1650_v62 = vpack.i.bf16 %v1952_v52, %v1955_v53  ;;  %v302_v4 = vrot.slane %v283_v59, 1 }
  0x92   : > { %v1645_v58 = vpack.i.bf16 %v393_v55, %v391_v54  ;;  %v299_v5 = vrot.slane %v1955_v53, 1  ;;  %v300_v6 = vrot.slane %v1952_v52, 1  ;;  %v1992_v8 = vsel %vm322_vm4, %v412_v63, %v413_v0 }
  0x93   : > { %v1995_v9 = vsel %vm322_vm4, %v413_v0, %v415_v61  ;;  %v326_v10 = vrot.slane %v283_v59, 2  ;;  %v323_v11 = vrot.slane %v1955_v53, 2  ;;  %v324_v12 = vrot.slane %v1952_v52, 2 }
  0x94   : > { %1646 = vrot.lane.b32.xlu0 %v1645_v58, %s1812_s8  ;;  %1641 = vrot.lane.b32.xlu1 %v1635_v48, %s1813_s11  ;;  %v301_v13 = vsel %vm298_vm3, %v299_v5, %v300_v6  ;;  %v303_v14 = vsel %vm298_vm3, %v300_v6, %v302_v4  ;;  %v1665_v17 = vpack.i.bf16 %v1995_v9, %v1992_v8 }
  0x95   : > { %v1670_v19 = vpack.i.bf16 %v303_v14, %v301_v13  ;;  %v2015_v20 = vsel %vm322_vm4, %v323_v11, %v324_v12  ;;  %v2018_v21 = vsel %vm322_vm4, %v324_v12, %v326_v10  ;;  %v1763_v12 = vld [vmem:[%s2207_s2 + $0x100] sm:$0xff]   ;;  %v1764_v14 = vld [vmem:[%s2207_s2 + $0x148] sm:$0xff]  }
  0x96   : > { %v1685_v23 = vpack.i.bf16 %v2018_v21, %v2015_v20 }
  0x98   : > { %1651 = vrot.lane.b32.xlu0 %v1650_v62, %s1813_s11  ;;  %1656 = vrot.lane.b32.xlu1 %v1645_v58, %s1814_s21 }
  0x9c   : > { %1661 = vrot.lane.b32.xlu0 %v1645_v58, %s1815_s27  ;;  %1666 = vrot.lane.b32.xlu1 %v1665_v17, %s1811_s26 }
  0xa0   : > { %1676 = vrot.lane.b32.xlu0 %v1650_v62, %s1811_s26  ;;  %1671 = vrot.lane.b32.xlu1 %v1670_v19, %s1812_s8 }
  0xa4   : > { %1686 = vrot.lane.b32.xlu0 %v1685_v23, %s1811_s26  ;;  %1681 = vrot.lane.b32.xlu1 %v1665_v17, %s1813_s11 }
  0xa8   : > { %1696 = vrot.lane.b32.xlu0 %v1670_v19, %s1815_s27  ;;  %1691 = vrot.lane.b32.xlu1 %v1670_v19, %s1814_s21 }
 0x102   : > { %v1637_v26 = vpop.permute.xlu1 %1636 }
 0x103   : > { %v1639_v27 = vunpack.i.h.bf16 %v1637_v26  ;;  %v1638_v28 = vunpack.i.l.bf16 %v1637_v26  ;;  %v1767_v26 = vld [vmem:[%s2207_s2 + $0x180] sm:$0xff]  }
 0x105   : > { %v430_v37 = vsel %vm342_vm5, %v1939_v46, %v1639_v27  ;;  %v429_v39 = vsel %vm342_vm5, %v1923_v35, %v1638_v28  ;;  %v1769_v28 = vld [vmem:[%s2207_s2 + $0x110] sm:$0xff]  }
 0x106   : > { %v1647_v29 = vpop.permute.xlu0 %1646  ;;  %v1642_v32 = vpop.permute.xlu1 %1641 }
 0x107   : > { %v1649_v30 = vunpack.i.h.bf16 %v1647_v29  ;;  %v1648_v31 = vunpack.i.l.bf16 %v1647_v29  ;;  %v1644_v33 = vunpack.i.h.bf16 %v1642_v32  ;;  %v1643_v34 = vunpack.i.l.bf16 %v1642_v32  ;;  %v1770_v29 = vld [vmem:[%s2207_s2 + $0x1c8] sm:$0xff]   ;;  %v1773_v32 = vld [vmem:[%s2207_s2 + $0x118] sm:$0xff]  }
 0x109   : > { %v432_v38 = vsel %vm342_vm5, %v1644_v33, %v1649_v30  ;;  %v431_v40 = vsel %vm342_vm5, %v1643_v34, %v1648_v31  ;;  %v1772_v30 = vld [vmem:[%s2207_s2 + $0x158] sm:$0xff]   ;;  %v1771_v31 = vld [vmem:[%s2207_s2 + $0x188] sm:$0xff]   ;;  %v1774_v33 = vld [vmem:[%s2207_s2 + $0x1d0] sm:$0xff]  }
 0x10a   : > { %v1652_v36 = vpop.permute.xlu0 %1651  ;;  %v1657_v41 = vpop.permute.xlu1 %1656  ;;  %v1705_v42 = vpack.i.bf16 %v432_v38, %v430_v37  ;;  %v1700_v43 = vpack.i.bf16 %v431_v40, %v429_v39  ;;  %v1776_v34 = vld [vmem:[%s2207_s2 + $0x160] sm:$0xff]   ;;  %v1778_v38 = vld [vmem:[%s2207_s2 + $0x1d8] sm:$0xff]   ;;  %v1780_v39 = vld [vmem:[%s2207_s2 + $0x168] sm:$0xff]  }
 0x10b   : > { %v1659_v45 = vunpack.i.h.bf16 %v1657_v41  ;;  %v1658_v47 = vunpack.i.l.bf16 %v1657_v41  ;;  %v1654_v55 = vunpack.i.h.bf16 %v1652_v36  ;;  %v1653_v56 = vunpack.i.l.bf16 %v1652_v36  ;;  %v1775_v36 = vld [vmem:[%s2207_s2 + $0x190] sm:$0xff]   ;;  %v1777_v37 = vld [vmem:[%s2207_s2 + $0x120] sm:$0xff]   ;;  %v1779_v40 = vld [vmem:[%s2207_s2 + $0x198] sm:$0xff]  }
 0x10c   : > { %1706 = vrot.lane.b32.xlu0 %v1705_v42, %s1812_s8  ;;  %1701 = vrot.lane.b32.xlu1 %v1700_v43, %s1812_s8  ;;  %v1781_v41 = vld [vmem:[%s2207_s2 + $0x128] sm:$0xff]   ;;  %v1782_v42 = vld [vmem:[%s2207_s2 + $0x1e0] sm:$0xff]  }
 0x10d   : > { %v1784_v43 = vld [vmem:[%s2207_s2 + $0x170] sm:$0xff]  }
 0x10e   : > { %v1662_v44 = vpop.permute.xlu0 %1661  ;;  %v1667_v46 = vpop.permute.xlu1 %1666 }
 0x10f   : > { %v1664_v48 = vunpack.i.h.bf16 %v1662_v44  ;;  %v1663_v49 = vunpack.i.l.bf16 %v1662_v44  ;;  %v1669_v50 = vunpack.i.h.bf16 %v1667_v46  ;;  %v1668_v51 = vunpack.i.l.bf16 %v1667_v46  ;;  %v1783_v44 = vld [vmem:[%s2207_s2 + $0x1a0] sm:$0xff]   ;;  %v1789_v46 = vld [vmem:[%s2207_s2 + $0x138] sm:$0xff]  }
 0x110   : > { %1711 = vrot.lane.b32.xlu1 %v1685_v23, %s1813_s11 }
 0x111   : > { %v433_v35 = vsel %vm342_vm5, %v1658_v47, %v1663_v49  ;;  %v434_v54 = vsel %vm342_vm5, %v1659_v45, %v1664_v48  ;;  %v435_v58 = vsel %vm342_vm5, %v1992_v8, %v1668_v51  ;;  %v436_v59 = vsel %vm342_vm5, %v1995_v9, %v1669_v50  ;;  %v1785_v45 = vld [vmem:[%s2207_s2 + $0x130] sm:$0xff]   ;;  %v1786_v47 = vld [vmem:[%s2207_s2 + $0x1e8] sm:$0xff]   ;;  %v1788_v48 = vld [vmem:[%s2207_s2 + $0x178] sm:$0xff]  }
 0x112   : > { %v1677_v57 = vpop.permute.xlu0 %1676  ;;  %v1672_v62 = vpop.permute.xlu1 %1671  ;;  %v1715_v63 = vpack.i.bf16 %v435_v58, %v433_v35  ;;  %v1720_v0 = vpack.i.bf16 %v436_v59, %v434_v54  ;;  %v1787_v49 = vld [vmem:[%s2207_s2 + $0x1a8] sm:$0xff]   ;;  %v1790_v50 = vld [vmem:[%s2207_s2 + $0x1f0] sm:$0xff]   ;;  %v1793_v35 = vld [vmem:[%s2207_s2 + $0x1f8] sm:$0xff]   ;;  %v1816_v54 = vmov 0.0  }
 0x113   : > { %v1679_v60 = vunpack.i.h.bf16 %v1677_v57  ;;  %v1678_v61 = vunpack.i.l.bf16 %v1677_v57  ;;  %v1674_v1 = vunpack.i.h.bf16 %v1672_v62  ;;  %v1673_v2 = vunpack.i.l.bf16 %v1672_v62  ;;  %v1791_v51 = vld [vmem:[%s2207_s2 + $0x1b0] sm:$0xff]  }
 0x114   : > { %1716 = vrot.lane.b32.xlu0 %v1715_v63, %s1812_s8  ;;  %1721 = vrot.lane.b32.xlu1 %v1720_v0, %s1812_s8 }
 0x115   : > { %v343_v3 = vsel %vm342_vm5, %v1955_v53, %v1678_v61  ;;  %v344_v4 = vsel %vm342_vm5, %v1952_v52, %v1679_v60  ;;  %v345_v6 = vsel %vm342_vm5, %v1653_v56, %v1673_v2  ;;  %v346_v7 = vsel %vm342_vm5, %v1654_v55, %v1674_v1  ;;  %v1794_v55 = vld [vmem:[%s2207_s2 + $0x1b8] sm:$0xff]  }
 0x116   : > { %v1687_v5 = vpop.permute.xlu0 %1686  ;;  %v1682_v10 = vpop.permute.xlu1 %1681  ;;  %v486_v11 = vpack.c.bf16 %v346_v7, %v345_v6  ;;  %v485_v13 = vpack.c.bf16 %v344_v4, %v343_v3  ;;  %v1792_v6 = vld [vmem:[%s2207_s2 + $0x200] sm:$0xff]  }
 0x117   : > { %v1689_v8 = vunpack.i.h.bf16 %v1687_v5  ;;  %v1688_v9 = vunpack.i.l.bf16 %v1687_v5 }
 0x118   : > { %1109 = vmatprep.mubr.bf16.mxu0 %v486_v11  ;;  %1726 = vrot.lane.b32.xlu0 %v1682_v10, %s1812_s8 }
 0x119   : > { %v349_v53 = vsel %vm342_vm5, %v2015_v20, %v1688_v9  ;;  %v350_v52 = vsel %vm342_vm5, %v2018_v21, %v1689_v8  ;;  %1110 = vmatmul.mubr.bf16.vlgmr.msra.gmra.mrb[0].mxu0 %v485_v13  ;;  %v1768_v21 = vld [vmem:[%s2207_s2 + $0x150] sm:$0xff]  }
 0x11a   : > { %v1697_v15 = vpop.permute.xlu0 %1696  ;;  %v488_v16 = vpack.c.bf16 %v350_v52, %v349_v53  ;;  %v1692_v19 = vpop.permute.xlu1 %1691  ;;  %1537 = vmatpush3.bf16.msra.mxu0 %v1763_v12 }
 0x11b   : > { %v1699_v17 = vunpack.i.h.bf16 %v1697_v15  ;;  %v1698_v18 = vunpack.i.l.bf16 %v1697_v15  ;;  %v1694_v23 = vunpack.i.h.bf16 %v1692_v19  ;;  %v1693_v20 = vunpack.i.l.bf16 %v1692_v19  ;;  %1538 = vmatprep.subr.bf16.mxu0 %v1764_v14  ;;  %v1796_v19 = vld [vmem:[%s2207_s2 + $0x210] sm:$0xff]  }
 0x11c   : > { %1150 = vmatprep.mubr.bf16.mxu1 %v488_v16  ;;  %v1795_v16 = vld [vmem:[%s2207_s2 + $0x208] sm:$0xff]  }
 0x11d   : > { %v347_v24 = vsel %vm342_vm5, %v1693_v20, %v1698_v18  ;;  %v348_v25 = vsel %vm342_vm5, %v1694_v23, %v1699_v17  ;;  %v1798_v23 = vld [vmem:[%s2207_s2 + $0x220] sm:$0xff]   ;;  %v1799_v20 = vld [vmem:[%s2207_s2 + $0x228] sm:$0xff]  }
 0x11e   : > { %v487_v27 = vpack.c.bf16 %v348_v25, %v347_v24  ;;  %1539 = vmatpush3.bf16.msra.mxu0 %v1765_v22  ;;  %v1797_v22 = vld [vmem:[%s2207_s2 + $0x218] sm:$0xff]   ;;  %v1800_v24 = vld [vmem:[%s2207_s2 + $0x230] sm:$0xff]  }
 0x11f   : > { %1540 = vmatprep.subr.bf16.mxu0 %v1768_v21 }
 0x120   : > { %1151 = vmatmul.mubr.bf16.vlgmr.msra.gmra.mrb[0].mxu1 %v487_v27  ;;  %v1801_v27 = vld [vmem:[%s2207_s2 + $0x238] sm:$0xff]  }
 0x121   : > { %1559 = vmatpush3.bf16.msra.mxu1 %v1767_v26 }
 0x122   : > { %1541 = vmatpush3.bf16.msra.mxu0 %v1769_v28  ;;  %1560 = vmatprep.subr.bf16.mxu1 %v1770_v29 }
 0x123   : > { %1542 = vmatprep.subr.bf16.mxu0 %v1772_v30 }
 0x125   : > { %1561 = vmatpush3.bf16.msra.mxu1 %v1771_v31 }
 0x126   : > { %1543 = vmatpush3.bf16.msra.mxu0 %v1773_v32  ;;  %1562 = vmatprep.subr.bf16.mxu1 %v1774_v33 }
 0x127   : > { %1544 = vmatprep.subr.bf16.mxu0 %v1776_v34 }
 0x129   : > { %1563 = vmatpush3.bf16.msra.mxu1 %v1775_v36 }
 0x12a   : > { %1545 = vmatpush3.bf16.msra.mxu0 %v1777_v37  ;;  %1564 = vmatprep.subr.bf16.mxu1 %v1778_v38  ;;  %v1414_v38 = vld [vmem:[%s2208_s3] ss:$0 sm:$0xff] }
 0x12b   : > { %1546 = vmatprep.subr.bf16.mxu0 %v1780_v39 }
 0x12d   : > { %1565 = vmatpush3.bf16.msra.mxu1 %v1779_v40 }
 0x12e   : > { %1547 = vmatpush3.bf16.msra.mxu0 %v1781_v41  ;;  %1566 = vmatprep.subr.bf16.mxu1 %v1782_v42 }
 0x12f   : > { %1548 = vmatprep.subr.bf16.mxu0 %v1784_v43 }
 0x131   : > { %1567 = vmatpush3.bf16.msra.mxu1 %v1783_v44 }
 0x132   : > { %1549 = vmatpush3.bf16.msra.mxu0 %v1785_v45  ;;  %1568 = vmatprep.subr.bf16.mxu1 %v1786_v47 }
 0x133   : > { %1550 = vmatprep.subr.bf16.mxu0 %v1788_v48 }
 0x135   : > { %1569 = vmatpush3.bf16.msra.mxu1 %v1787_v49 }
 0x136   : > { %1551 = vmatpush3.bf16.msra.mxu0 %v1789_v46  ;;  %1570 = vmatprep.subr.bf16.mxu1 %v1790_v50 }
 0x137   : > { %1589 = vmatprep.subr.bf16.mxu0 %v1816_v54 }
 0x139   : > { %1571 = vmatpush3.bf16.msra.mxu1 %v1791_v51 }
 0x13a   : > { %1572 = vmatprep.subr.bf16.mxu1 %v1793_v35 }
 0x13d   : > { %1573 = vmatpush3.bf16.msra.mxu1 %v1794_v55 }
 0x17e   : > { %v1707_v56 = vpop.permute.xlu0 %1706  ;;  %v1702_v57 = vpop.permute.xlu1 %1701 }
 0x17f   : > { %v1709_v58 = vunpack.i.h.bf16 %v1707_v56  ;;  %v1708_v59 = vunpack.i.l.bf16 %v1707_v56  ;;  %v1704_v60 = vunpack.i.h.bf16 %v1702_v57  ;;  %v1703_v61 = vunpack.i.l.bf16 %v1702_v57 }
 0x181   : > { %v465_v62 = vsel %vm342_vm5, %v1703_v61, %v1704_v60  ;;  %v469_v63 = vsel %vm342_vm5, %v1708_v59, %v1709_v58 }
 0x182   : > { %v1712_v0 = vpop.permute.xlu1 %1711  ;;  %v490_v1 = vpack.c.bf16 %v469_v63, %v465_v62 }
 0x183   : > { %v1714_v2 = vunpack.i.h.bf16 %v1712_v0  ;;  %v1713_v3 = vunpack.i.l.bf16 %v1712_v0 }
 0x184   : > { %1191 = vmatprep.mubr.bf16.mxu0 %v490_v1 }
 0x185   : > { %v484_v4 = vsel %vm342_vm5, %v1714_v2, %v1708_v59  ;;  %v483_v5 = vsel %vm342_vm5, %v1713_v3, %v1703_v61 }
 0x186   : > { %v489_v7 = vpack.c.bf16 %v484_v4, %v483_v5  ;;  %v1717_v8 = vpop.permute.xlu0 %1716  ;;  %v1722_v9 = vpop.permute.xlu1 %1721 }
 0x187   : > { %v1719_v10 = vunpack.i.h.bf16 %v1717_v8  ;;  %v1718_v11 = vunpack.i.l.bf16 %v1717_v8  ;;  %v1724_v12 = vunpack.i.h.bf16 %v1722_v9  ;;  %v1723_v13 = vunpack.i.l.bf16 %v1722_v9 }
 0x188   : > { %1192 = vmatmul.mubr.bf16.vlgmr.msra.gmra.mrb[4].mxu0 %v489_v7 }
 0x189   : > { %v466_v53 = vsel %vm342_vm5, %v1704_v60, %v1718_v11  ;;  %v470_v52 = vsel %vm342_vm5, %v1709_v58, %v1723_v13  ;;  %1590 = vmatpush3.bf16.msra.mxu0 %v1792_v6  ;;  %v467_v14 = vsel %vm342_vm5, %v1718_v11, %v1719_v10  ;;  %v471_v15 = vsel %vm342_vm5, %v1723_v13, %v1724_v12 }
 0x18a   : > { %v491_v17 = vpack.c.bf16 %v470_v52, %v466_v53  ;;  %1591 = vmatprep.subr.bf16.mxu0 %v1816_v54  ;;  %v492_v18 = vpack.c.bf16 %v471_v15, %v467_v14  ;;  %1605 = vmatprep.mubr.msk.bf16.mxu0 %vm1817_vm6, %v1816_v54  ;;  %v1727_v21 = vpop.permute.xlu0 %1726 }
 0x18b   : > { %v1729_v25 = vunpack.i.h.bf16 %v1727_v21  ;;  %v1728_v26 = vunpack.i.l.bf16 %v1727_v21 }
 0x18c   : > { %1232 = vmatprep.mubr.bf16.mxu1 %v492_v18 }
 0x18d   : > { %1592 = vmatpush3.bf16.msra.mxu0 %v1795_v16  ;;  %1233 = vmatmul.mubr.bf16.vlgmr.msra.gmra.mrb[4].mxu1 %v491_v17  ;;  %v472_v28 = vsel %vm342_vm5, %v1724_v12, %v1729_v25  ;;  %v468_v29 = vsel %vm342_vm5, %v1719_v10, %v1728_v26 }
 0x18e   : > { %1593 = vmatprep.subr.bf16.mxu0 %v1816_v54  ;;  %v493_v30 = vpack.c.bf16 %v472_v28, %v468_v29 }
 0x191   : > { %1594 = vmatpush3.bf16.msra.mxu0 %v1796_v19 }
 0x192   : > { %1595 = vmatprep.subr.bf16.mxu0 %v1816_v54 }
 0x195   : > { %1596 = vmatpush3.bf16.msra.mxu0 %v1797_v22 }
 0x196   : > { %1597 = vmatprep.subr.bf16.mxu0 %v1816_v54 }
 0x199   : > { %1598 = vmatpush3.bf16.msra.mxu0 %v1798_v23 }
 0x19a   : > { %1599 = vmatprep.subr.bf16.mxu0 %v1816_v54 }
 0x19d   : > { %1600 = vmatpush3.bf16.msra.mxu0 %v1799_v20 }
 0x19e   : > { %1601 = vmatprep.subr.bf16.mxu0 %v1816_v54 }
 0x1a1   : > { %1602 = vmatpush3.bf16.msra.mxu0 %v1800_v24 }
 0x1a2   : > { %1603 = vmatprep.subr.bf16.mxu0 %v1816_v54 }
 0x1a5   : > { %1604 = vmatpush3.bf16.msra.mxu0 %v1801_v27 }
 0x1a8   : > { %1606 = vmatmul.mubr.bf16.vlgmr.msra.gmra.mrb[8].mxu0 %v493_v30 }
 0x1ec   : > { %v1508_v31 = vpop.f32.mrb[0].mxu0 }
 0x1ed   : > { %v1509_v32 = vpop.f32.mrb[1].mxu0 }
 0x1ee   : > { %v1510_v33 = vadd.f32 %v1509_v32, %v1508_v31  ;;  %v1511_v34 = vpop.f32.mrb[2].mxu0 }
 0x1ef   : > { %v1512_v36 = vpop.f32.mrb[3].mxu0 }
 0x1f0   : > { %v1513_v37 = vadd.f32 %v1512_v36, %v1511_v34  ;;  %v1112_v41 = vadd.f32 %v1510_v33, %v1414_v38 }
 0x1f2   : > { %v1115_v45 = vadd.f32 %v1513_v37, %v1414_v38 }
 0x1f3   : > { %v1530_v39 = vpop.f32.mrb[0].mxu1 }
 0x1f4   : > { %v1531_v40 = vpop.f32.mrb[1].mxu1 }
 0x1f5   : > { %v1532_v42 = vadd.f32 %v1531_v40, %v1530_v39  ;;  %v1533_v43 = vpop.f32.mrb[2].mxu1 }
 0x1f6   : > { %v1534_v44 = vpop.f32.mrb[3].mxu1 }
 0x1f7   : > { %v1153_v47 = vadd.f32 %v1532_v42, %v1112_v41  ;;  %v1535_v48 = vadd.f32 %v1534_v44, %v1533_v43 }
 0x1f9   : > { %v1156_v49 = vadd.f32 %v1535_v48, %v1115_v45 }
 0x25b   : > { %v1552_v46 = vpop.f32.mrb[4].mxu0 }
 0x25c   : > { %v1553_v50 = vpop.f32.mrb[5].mxu0 }
 0x25d   : > { %v1554_v51 = vadd.f32 %v1553_v50, %v1552_v46  ;;  %v1555_v35 = vpop.f32.mrb[6].mxu0 }
 0x25e   : > { %v1556_v54 = vpop.f32.mrb[7].mxu0 }
 0x25f   : > { %v1194_v55 = vadd.f32 %v1554_v51, %v1153_v47  ;;  %v1557_v56 = vadd.f32 %v1556_v54, %v1555_v35 }
 0x260   : > { %v1574_v57 = vpop.f32.mrb[4].mxu1 }
 0x261   : > { %v1197_v58 = vadd.f32 %v1557_v56, %v1156_v49  ;;  %v1575_v59 = vpop.f32.mrb[5].mxu1 }
 0x262   : > { %v1576_v60 = vadd.f32 %v1575_v59, %v1574_v57  ;;  %v1577_v61 = vpop.f32.mrb[6].mxu1 }
 0x263   : > { %v1578_v62 = vpop.f32.mrb[7].mxu1 }
 0x264   : > { %v1579_v63 = vadd.f32 %v1578_v62, %v1577_v61  ;;  %v1235_v0 = vadd.f32 %v1576_v60, %v1194_v55 }
 0x266   : > { %v1238_v1 = vadd.f32 %v1579_v63, %v1197_v58 }
 0x27b   : > { %v1275_v2 = vpop.f32.mrb[8].mxu0 }
 0x27c   : > { %v1276_v3 = vadd.f32 %v1275_v2, %v1235_v0  ;;  %v1607_v4 = vpop.f32.mrb[9].mxu0 }
 0x27d   : > { %v1278_v5 = vpop.f32.mrb[10].mxu0 }
 0x27e   : > { %v1282_v6 = vmax.f32 %v1276_v3, 0.0  ;;  %v1279_v7 = vadd.f32 %v1278_v5, %v1238_v1  ;;  %v1608_v8 = vpop.f32.mrb[11].mxu0 }
 0x280   : > { %1284 = vst [vmem:[%s251_s28] sm:$0xff] %v1282_v6  ;;  %v1283_v9 = vmax.f32 %v1279_v7, 0.0  ;;  %v1293_v10 = vmul.f32 %v1282_v6, %v1282_v6 }
 0x282   : > { %1285 = vst [vmem:[%s251_s28 + $0x8] sm:$0xff] %v1283_v9  ;;  %v1286_v11 = vadd.f32 %v1283_v9, %v1282_v6  ;;  %v1294_v12 = vmul.f32 %v1283_v9, %v1283_v9 }
 0x284   : > { %v1287_v13 = vrot.slane %v1286_v11, 4  ;;  %v1295_v53 = vadd.f32 %v1294_v12, %v1293_v10 }
 0x286   : > { %v1288_v52 = vadd.f32 %v1287_v13, %v1286_v11  ;;  %v1296_v14 = vrot.slane %v1295_v53, 4 }
 0x288   : > { %v1289_v15 = vrot.slane %v1288_v52, 2  ;;  %v1297_v16 = vadd.f32 %v1296_v14, %v1295_v53 }
 0x28a   : > { %v1290_v17 = vadd.f32 %v1289_v15, %v1288_v52  ;;  %v1298_v18 = vrot.slane %v1297_v16, 2 }
 0x28c   : > { %v1291_v19 = vrot.slane %v1290_v17, 1  ;;  %v1299_v22 = vadd.f32 %v1298_v18, %v1297_v16 }
 0x28e   : > { %v1300_v23 = vrot.slane %v1299_v22, 1  ;;  %v1292_v20 = vadd.f32 %v1291_v19, %v1290_v17 }
 0x290   : > { %v1301_v21 = vadd.f32 %v1300_v23, %v1299_v22 }
 0x292   : > { %v1302_v24 = vsel %vm275_vm2, %v1292_v20, %v1301_v21 }
 0x293   : > { %1303 = vst [vmem:[%s255_s6] sm:$0x3] %v1302_v24 }
 0x294 PF: > { %s16_s18 = sadd.s32 1, %s1808_s18  }
 0x295   : > { %p13_p4 = scmp.ge.s32.totalorder %s16_s18, 4  }
 0x297   :  { %15 = sbr.rel (!%p13_p4) target bundleno = 1 (0x1), region = 81 }

// kernel: up_forward.4
= control target key start
LH: loop header
LB: loop body
LE: loop exit
PB: predicated region body
PF: predicated region fallthrough
CT: control target
= control target key end

     0   :  { %s1736_s21 = smov 0   ;;  %s2053_s0 = inlined_call_operand.vmem [shape: f32[2,16,128], index: 0, kind: input, shape index: {}]   ;;  %s2054_s1 = inlined_call_operand.vmem [shape: f32[1,128], index: 1, kind: input, shape index: {}]   ;;  %s2055_s2 = inlined_call_operand.vmem [shape: f32[1,128], index: 2, kind: input, shape index: {}]   ;;  %s2056_s3 = inlined_call_operand.vmem [shape: bf16[1152,128], index: 3, kind: input, shape index: {}]   ;;  %s2057_s4 = inlined_call_operand.vmem [shape: f32[1,128], index: 4, kind: input, shape index: {}]   ;;  %s2058_s5 = inlined_call_operand.vmem [shape: f32[2,16,128], index: 5, kind: output, shape index: {0}]   ;;  %s2059_s6 = inlined_call_operand.vmem [shape: f32[2,2,128], index: 6, kind: output, shape index: {1}]  }
   0x1 LB: > { %s1326_s22 = sadd.s32 4294967295, %s1693_s21   ;;  %p1330_p0 = scmp.ge.s32.totalorder %s1693_s21, 1  ;;  %s1693_s21 = sphi %s1736_s21, %s17_s21  }
   0x2   : > { %p215_p1 = scmp.lt.s32.totalorder %s1693_s21, 3 }
   0x4   : > { %p216_p2 = pnand %p1330_p0, %p215_p1 }
   0x5   : > { %p249_p3 = scmp.lt.s32.totalorder (!%p216_p2), %s1326_s22, 1  ;;  %v1336_v0 = vld [vmem:[%s2054_s1] ss:$0 sm:$0xff] (!%p216_p2)  ;;  %s1695_s7 = smov (!%p216_p2), 8   ;;  %v1618_v12 = vld [vmem:[%s2056_s3 + $0x48] sm:$0xff] (!%p216_p2)   ;;  %v1622_v17 = vld [vmem:[%s2056_s3 + $0x50] sm:$0xff] (!%p216_p2)  }
   0x6   : > { %219 = sbr.rel (%p216_p2) target bundleno = 568 (0x238), region = 40  ;;  %v1337_v1 = vld [vmem:[%s2055_s2] ss:$0 sm:$0xff] (!%p216_p2)  ;;  %v1621_v14 = vld [vmem:[%s2056_s3 + $0xc8] sm:$0xff] (!%p216_p2)   ;;  %v1625_v18 = vld [vmem:[%s2056_s3 + $0xd0] sm:$0xff] (!%p216_p2)   ;;  %vm292_vm0 = vcmask (!%p216_p2), 64512  }
   0x7   : > { %v1615_v9 = vld [vmem:[%s2056_s3 + $0x40] sm:$0xff] (!%p216_p2)   ;;  %v1620_v15 = vld [vmem:[%s2056_s3 + $0x8] sm:$0xff] (!%p216_p2)   ;;  %v1624_v19 = vld [vmem:[%s2056_s3 + $0x10] sm:$0xff] (!%p216_p2)   ;;  %vm301_vm1 = vcmask (!%p216_p2), 1040384   ;;  %vm346_vm2 = vcmask (!%p216_p2), 1046528   ;;  %s1696_s13 = smov (!%p216_p2), 120  }
   0x8   : > { %v1616_v10 = vld [vmem:[%s2056_s3] sm:$0xff] (!%p216_p2)   ;;  %1419 = vmatprep.subr.bf16.mxu0 (!%p216_p2), %v1615_v9  ;;  %v1623_v16 = vld [vmem:[%s2056_s3 + $0x88] sm:$0xff] (!%p216_p2)   ;;  %v1627_v20 = vld [vmem:[%s2056_s3 + $0x90] sm:$0xff] (!%p216_p2)   ;;  %vm384_vm3 = vcmask (!%p216_p2), 1045504   ;;  %s1697_s14 = smov (!%p216_p2), 112   ;;  %vm327_vm4 = vcmask (!%p216_p2), 982016  }
   0x9   : > { %v1617_v11 = vld [vmem:[%s2056_s3 + $0xc0] sm:$0xff] (!%p216_p2)   ;;  %1420 = vmatpush3.bf16.msra.mxu0 (!%p216_p2), %v1616_v10  ;;  %v1626_v21 = vld [vmem:[%s2056_s3 + $0x58] sm:$0xff] (!%p216_p2)   ;;  %v1634_v29 = vld [vmem:[%s2056_s3 + $0x68] sm:$0xff] (!%p216_p2)   ;;  %vm340_vm6 = vcmask (!%p216_p2), 916480   ;;  %vm1698_vm7 = vmmov (!%p216_p2), 1   ;;  %vm1700_vm9 = vmmov (!%p216_p2), 0  }
   0xa   : > { %v1619_v13 = vld [vmem:[%s2056_s3 + $0x80] sm:$0xff] (!%p216_p2)   ;;  %1441 = vmatprep.subr.bf16.mxu1 (!%p216_p2), %v1617_v11  ;;  %1421 = vmatprep.subr.bf16.mxu0 (!%p216_p2), %v1618_v12  ;;  %v1629_v22 = vld [vmem:[%s2056_s3 + $0xd8] sm:$0xff] (!%p216_p2)   ;;  %v1637_v30 = vld [vmem:[%s2056_s3 + $0xe8] sm:$0xff] (!%p216_p2)  }
   0xb   : > { %1442 = vmatpush3.bf16.msra.mxu1 (!%p216_p2), %v1619_v13  ;;  %v1628_v23 = vld [vmem:[%s2056_s3 + $0x18] sm:$0xff] (!%p216_p2)   ;;  %v1630_v25 = vld [vmem:[%s2056_s3 + $0x60] sm:$0xff] (!%p216_p2)   ;;  %v1636_v31 = vld [vmem:[%s2056_s3 + $0x28] sm:$0xff] (!%p216_p2)  }
   0xc   : > { %1443 = vmatprep.subr.bf16.mxu1 (!%p216_p2), %v1621_v14  ;;  %v1631_v24 = vld [vmem:[%s2056_s3 + $0x98] sm:$0xff] (!%p216_p2)   ;;  %v1633_v26 = vld [vmem:[%s2056_s3 + $0xe0] sm:$0xff] (!%p216_p2)   ;;  %v1639_v32 = vld [vmem:[%s2056_s3 + $0xa8] sm:$0xff] (!%p216_p2)  }
   0xd   : > { %s2061_s22 = smov (!%p249_p3, %s1326_s22), 1  ;;  %1422 = vmatpush3.bf16.msra.mxu0 %v1620_v15  ;;  %v1632_v27 = vld [vmem:[%s2056_s3 + $0x20] sm:$0xff]   ;;  %v1638_v33 = vld [vmem:[%s2056_s3 + $0x70] sm:$0xff]   ;;  %v1642_v36 = vld [vmem:[%s2056_s3 + $0x78] sm:$0xff]  }
   0xe   : > { %s1417_s25 = sshll.u32 %s2061_s22, 4  ;;  %1423 = vmatprep.subr.bf16.mxu0 %v1622_v17  ;;  %v1635_v28 = vld [vmem:[%s2056_s3 + $0xa0] sm:$0xff]   ;;  %v1640_v34 = vld [vmem:[%s2056_s3 + $0x30] sm:$0xff]   ;;  %v1644_v38 = vld [vmem:[%s2056_s3 + $0x38] sm:$0xff]  }
   0xf   : > { %s253_s30 = scalar_lea.vmem %s2053_s0, %s1417_s25  ;;  %1444 = vmatpush3.bf16.msra.mxu1 %v1623_v16  ;;  %v1641_v35 = vld [vmem:[%s2056_s3 + $0xf0] sm:$0xff]   ;;  %v1645_v42 = vld [vmem:[%s2056_s3 + $0xf8] sm:$0xff]   ;;  %v1647_v48 = vld [vmem:[%s2056_s3 + $0x140] sm:$0xff]   ;;  %s258_s11 = scalar_lea.vmem %s2058_s5, %s1417_s25 }
  0x10   : > { %v264_v2 = vld [vmem:[%s253_s30] sm:$0xff]  ;;  %v265_v3 = vld [vmem:[%s253_s30 + $0x8] sm:$0xff]  ;;  %1445 = vmatprep.subr.bf16.mxu1 %v1625_v18  ;;  %v1643_v37 = vld [vmem:[%s2056_s3 + $0xb0] sm:$0xff]   ;;  %s1335_s25 = sshll.u32 %s2061_s22, 1 }
  0x11   : > { %v273_v4 = vmul.f32 %v1336_v0, %v264_v2  ;;  %v274_v5 = vmul.f32 %v1336_v0, %v265_v3  ;;  %1424 = vmatpush3.bf16.msra.mxu0 %v1624_v19  ;;  %v1646_v47 = vld [vmem:[%s2056_s3 + $0xb8] sm:$0xff]   ;;  %v1649_v57 = vld [vmem:[%s2056_s3 + $0x1c0] sm:$0xff]   ;;  %vm1411_vm5 = vmneg %vm301_vm1 }
  0x12   : > { %1425 = vmatprep.subr.bf16.mxu0 %v1626_v21  ;;  %vm1412_vm8 = vmpackc.low %vm1698_vm7, %vm1411_vm5 }
  0x13   : > { %v282_v6 = vadd.f32 %v1337_v1, %v273_v4  ;;  %v283_v7 = vadd.f32 %v1337_v1, %v274_v5  ;;  %1446 = vmatpush3.bf16.msra.mxu1 %v1627_v20 }
  0x14   : > { %1447 = vmatprep.subr.bf16.mxu1 %v1629_v22 }
  0x15   : > { %v1550_v8 = vpack.i.bf16 %v283_v7, %v282_v6  ;;  %1426 = vmatpush3.bf16.msra.mxu0 %v1628_v23 }
  0x16   : > { %1427 = vmatprep.subr.bf16.mxu0 %v1630_v25 }
  0x17   : > { %1551 = vrot.lane.b32.xlu0 %v1550_v8, %s1695_s7  ;;  %1448 = vmatpush3.bf16.msra.mxu1 %v1631_v24 }
  0x18   : > { %1449 = vmatprep.subr.bf16.mxu1 %v1633_v26 }
  0x19   : > { %1428 = vmatpush3.bf16.msra.mxu0 %v1632_v27 }
  0x1a   : > { %1429 = vmatprep.subr.bf16.mxu0 %v1634_v29 }
  0x1b   : > { %1450 = vmatpush3.bf16.msra.mxu1 %v1635_v28 }
  0x1c   : > { %1451 = vmatprep.subr.bf16.mxu1 %v1637_v30 }
  0x1d   : > { %1430 = vmatpush3.bf16.msra.mxu0 %v1636_v31 }
  0x1e   : > { %1431 = vmatprep.subr.bf16.mxu0 %v1638_v33 }
  0x1f   : > { %1452 = vmatpush3.bf16.msra.mxu1 %v1639_v32 }
  0x20   : > { %1453 = vmatprep.subr.bf16.mxu1 %v1641_v35 }
  0x21   : > { %1432 = vmatpush3.bf16.msra.mxu0 %v1640_v34 }
  0x22   : > { %1433 = vmatprep.subr.bf16.mxu0 %v1642_v36 }
  0x23   : > { %1454 = vmatpush3.bf16.msra.mxu1 %v1643_v37 }
  0x24   : > { %1455 = vmatprep.subr.bf16.mxu1 %v1645_v42  ;;  %v1650_v42 = vld [vmem:[%s2056_s3 + $0x148] sm:$0xff]  }
  0x25   : > { %1434 = vmatpush3.bf16.msra.mxu0 %v1644_v38  ;;  %v1648_v38 = vld [vmem:[%s2056_s3 + $0x100] sm:$0xff]  }
  0x26   : > { %1463 = vmatprep.subr.bf16.mxu0 %v1647_v48 }
  0x27   : > { %1456 = vmatpush3.bf16.msra.mxu1 %v1646_v47  ;;  %v1651_v47 = vld [vmem:[%s2056_s3 + $0x180] sm:$0xff]  }
  0x28   : > { %1485 = vmatprep.subr.bf16.mxu1 %v1649_v57 }
  0x89   : > { %v1552_v39 = vpop.permute.xlu0 %1551 }
  0x8a   : > { %v1554_v40 = vunpack.i.h.bf16 %v1552_v39  ;;  %v1553_v41 = vunpack.i.l.bf16 %v1552_v39 }
  0x8c   : > { %v294_v43 = vsel %vm292_vm0, 0.0, %v1554_v40  ;;  %v296_v44 = vsel %vm292_vm0, %v1554_v40, 0.0  ;;  %v293_v45 = vsel %vm292_vm0, 0.0, %v1553_v41  ;;  %v295_v46 = vsel %vm292_vm0, %v1553_v41, 0.0 }
  0x8d   : > { %v304_v49 = vrot.slane %v294_v43, 7  ;;  %v306_v50 = vrot.slane %v296_v44, 7  ;;  %v1857_v51 = vrot.slane %v293_v45, 7  ;;  %v303_v52 = vrot.slane %v295_v46, 7 }
  0x8f   : > { %v315_v53 = vsel %vm301_vm1, %v304_v49, 0.0  ;;  %v316_v54 = vsel %vm301_vm1, %v306_v50, 0.0  ;;  %v314_v55 = vsel %vm301_vm1, 0.0, %v303_v52  ;;  %v313_v56 = vsel %vm301_vm1, 0.0, %v1857_v51 }
  0x90   : > { %v358_v58 = vrot.slane %v316_v54, 1  ;;  %v1555_v59 = vpack.i.bf16 %v314_v55, %v313_v56  ;;  %v1869_v60 = vsel %vm301_vm1, %v1857_v51, %v304_v49  ;;  %v307_v61 = vsel %vm301_vm1, %v303_v52, %v306_v50  ;;  %v1652_v50 = vld [vmem:[%s2056_s3 + $0x108] sm:$0xff]  }
  0x91   : > { %v347_v62 = vrot.slane %v313_v56, 1  ;;  %v350_v63 = vrot.slane %v315_v53, 1  ;;  %v388_v0 = vrot.slane %v315_v53, 2  ;;  %v1560_v1 = vpack.i.bf16 %v307_v61, %v1869_v60 }
  0x92   : > { %1556 = vrot.lane.b32.xlu0 %v1555_v59, %s1696_s13  ;;  %v348_v2 = vrot.slane %v1869_v60, 1  ;;  %v356_v3 = vrot.slane %v307_v61, 1  ;;  %v355_v4 = vrot.slane %v314_v55, 1  ;;  %v386_v5 = vrot.slane %v1869_v60, 2 }
  0x93   : > { %1561 = vrot.lane.b32.xlu1 %v1560_v1, %s1696_s13  ;;  %v385_v8 = vrot.slane %v313_v56, 2  ;;  %v1413_v14 = vpack.c.bf16 %v1869_v60, %v1857_v51  ;;  %v395_v16 = vrot.slane %v316_v54, 2  ;;  %v393_v17 = vrot.slane %v307_v61, 2  ;;  %v1653_v51 = vld [vmem:[%s2056_s3 + $0x1c8] sm:$0xff]   ;;  %v1654_v54 = vld [vmem:[%s2056_s3 + $0x150] sm:$0xff]  }
  0x94   : > { %v349_v6 = vsel %vm346_vm2, %v347_v62, %v348_v2  ;;  %v351_v7 = vsel %vm346_vm2, %v348_v2, %v350_v63  ;;  %v359_v10 = vsel %vm346_vm2, %v356_v3, %v358_v58  ;;  %v1881_v11 = vsel %vm384_vm3, %v386_v5, %v388_v0  ;;  %v1655_v58 = vld [vmem:[%s2056_s3 + $0x188] sm:$0xff]   ;;  %v1656_v61 = vld [vmem:[%s2056_s3 + $0x110] sm:$0xff]   ;;  %v1658_v63 = vld [vmem:[%s2056_s3 + $0x158] sm:$0xff]  }
  0x95   : > { %v424_v9 = vpack.c.bf16 %v351_v7, %v349_v6  ;;  %v357_v12 = vsel %vm346_vm2, %v355_v4, %v356_v3  ;;  %v1885_v13 = vsel %vm384_vm3, %v385_v8, %v386_v5  ;;  %v1580_v15 = vpack.i.bf16 %v359_v10, %v351_v7  ;;  %v1657_v62 = vld [vmem:[%s2056_s3 + $0x1d0] sm:$0xff]   ;;  %v1660_v5 = vld [vmem:[%s2056_s3 + $0x118] sm:$0xff]  }
  0x96   : > { %1571 = vrot.lane.b32.xlu0 %v1560_v1, %s1697_s14  ;;  %v427_v18 = vpack.c.bf16 %v1881_v11, %v1885_v13  ;;  %v1575_v19 = vpack.i.bf16 %v357_v12, %v349_v6  ;;  %v392_v20 = vrot.slane %v314_v55, 2  ;;  %v396_v21 = vsel %vm384_vm3, %v393_v17, %v395_v16  ;;  %v1659_v3 = vld [vmem:[%s2056_s3 + $0x190] sm:$0xff]   ;;  %v1661_v6 = vld [vmem:[%s2056_s3 + $0x1d8] sm:$0xff]   ;;  %v1664_v16 = vld [vmem:[%s2056_s3 + $0x120] sm:$0xff]  }
  0x97   : > { %1086 = vmatprep.mubr.bf16.mxu1 %v424_v9  ;;  %1566 = vrot.lane.b32.xlu1 %v1555_v59, %s1697_s14  ;;  %v1600_v23 = vpack.i.bf16 %v396_v21, %v1881_v11  ;;  %v1662_v9 = vld [vmem:[%s2056_s3 + $0x160] sm:$0xff]   ;;  %v1663_v12 = vld [vmem:[%s2056_s3 + $0x198] sm:$0xff]   ;;  %v1668_v21 = vld [vmem:[%s2056_s3 + $0x128] sm:$0xff]  }
  0x98   : > { %v394_v22 = vsel %vm384_vm3, %v392_v20, %v393_v17  ;;  %v1665_v17 = vld [vmem:[%s2056_s3 + $0x1e0] sm:$0xff]   ;;  %v1684_v11 = vld [vmem:[%s2056_s3 + $0x228] sm:$0xff]  }
  0x99   : > { %v1595_v24 = vpack.i.bf16 %v394_v22, %v1885_v13  ;;  %v1667_v20 = vld [vmem:[%s2056_s3 + $0x1a0] sm:$0xff]   ;;  %v1669_v22 = vld [vmem:[%s2056_s3 + $0x1e8] sm:$0xff]  }
  0x9a   : > { %1581 = vrot.lane.b32.xlu0 %v1580_v15, %s1697_s14 }
  0x9b   : > { %1576 = vrot.lane.b32.xlu1 %v1575_v19, %s1697_s14 }
  0x9e   : > { %1591 = vrot.lane.b32.xlu0 %v1580_v15, %s1696_s13 }
  0x9f   : > { %1586 = vrot.lane.b32.xlu1 %v1575_v19, %s1696_s13  ;;  %v1666_v19 = vld [vmem:[%s2056_s3 + $0x168] sm:$0xff]  }
  0xa2   : > { %1601 = vrot.lane.b32.xlu0 %v1600_v23, %s1696_s13 }
  0xa3   : > { %1596 = vrot.lane.b32.xlu1 %v1595_v24, %s1696_s13 }
  0xa6   : > { %1611 = vrot.lane.b32.xlu0 %v1600_v23, %s1697_s14  ;;  %v1670_v23 = vld [vmem:[%s2056_s3 + $0x170] sm:$0xff]  }
  0xa7   : > { %1606 = vrot.lane.b32.xlu1 %v1595_v24, %s1697_s14  ;;  %v1671_v24 = vld [vmem:[%s2056_s3 + $0x1a8] sm:$0xff]   ;;  %s262_s14 = scalar_lea.vmem %s2059_s6, %s1335_s25 }
 0x104   : > { %v1557_v25 = vpop.permute.xlu0 %1556 }
 0x105   : > { %v1559_v26 = vunpack.i.h.bf16 %v1557_v25  ;;  %v1558_v27 = vunpack.i.l.bf16 %v1557_v25  ;;  %v1562_v28 = vpop.permute.xlu1 %1561  ;;  %v1672_v25 = vld [vmem:[%s2056_s3 + $0x130] sm:$0xff]  }
 0x106   : > { %v1564_v29 = vunpack.i.h.bf16 %v1562_v28  ;;  %v1563_v30 = vunpack.i.l.bf16 %v1562_v28 }
 0x107   : > { %v328_v31 = vsel %vm327_vm4, %v1558_v27, %v1559_v26  ;;  %v1673_v26 = vld [vmem:[%s2056_s3 + $0x1f0] sm:$0xff]   ;;  %v1674_v27 = vld [vmem:[%s2056_s3 + $0x178] sm:$0xff]  }
 0x108   : > { %v1572_v32 = vpop.permute.xlu0 %1571  ;;  %v329_v35 = vsel %vm327_vm4, %v1563_v30, %v1564_v29 }
 0x109   : > { %v1574_v33 = vunpack.i.h.bf16 %v1572_v32  ;;  %v1573_v34 = vunpack.i.l.bf16 %v1572_v32  ;;  %v1567_v36 = vpop.permute.xlu1 %1566  ;;  %v422_v37 = vpack.c.bf16 %v329_v35, %v328_v31  ;;  %v1675_v32 = vld [vmem:[%s2056_s3 + $0x1b0] sm:$0xff]  }
 0x10a   : > { %v1569_v39 = vunpack.i.h.bf16 %v1567_v36  ;;  %v1568_v40 = vunpack.i.l.bf16 %v1567_v36 }
 0x10b   : > { %v342_v41 = vsel %vm340_vm6, %v1573_v34, %v1574_v33  ;;  %1045 = vmatprep.mubr.bf16.mxu0 %v422_v37  ;;  %v1676_v33 = vld [vmem:[%s2056_s3 + $0x138] sm:$0xff]  }
 0x10c   : > { %v1582_v43 = vpop.permute.xlu0 %1581  ;;  %1414 = vmatmul.mubr.msk.bf16.vlgmr.msra.gmra.mrb[0].mxu0 %vm1412_vm8, %v1413_v14  ;;  %v341_v46 = vsel %vm340_vm6, %v1568_v40, %v1569_v39  ;;  %v1677_v34 = vld [vmem:[%s2056_s3 + $0x1f8] sm:$0xff]   ;;  %v1699_v40 = vmov 0.0  }
 0x10d   : > { %v1584_v44 = vunpack.i.h.bf16 %v1582_v43  ;;  %v1583_v45 = vunpack.i.l.bf16 %v1582_v43  ;;  %1464 = vmatpush3.bf16.msra.mxu0 %v1648_v38  ;;  %v1577_v48 = vpop.permute.xlu1 %1576  ;;  %v423_v49 = vpack.c.bf16 %v342_v41, %v341_v46  ;;  %v1678_v37 = vld [vmem:[%s2056_s3 + $0x1b8] sm:$0xff]   ;;  %v1679_v38 = vld [vmem:[%s2056_s3 + $0x200] sm:$0xff]   ;;  %v1680_v41 = vld [vmem:[%s2056_s3 + $0x208] sm:$0xff]  }
 0x10e   : > { %v1579_v52 = vunpack.i.h.bf16 %v1577_v48  ;;  %v1578_v53 = vunpack.i.l.bf16 %v1577_v48  ;;  %1465 = vmatprep.subr.bf16.mxu0 %v1650_v42  ;;  %v1681_v42 = vld [vmem:[%s2056_s3 + $0x210] sm:$0xff]   ;;  %v1682_v43 = vld [vmem:[%s2056_s3 + $0x218] sm:$0xff]  }
 0x10f   : > { %v381_v55 = vsel %vm340_vm6, %v1583_v45, %v1584_v44  ;;  %1087 = vmatmul.mubr.bf16.vlgmr.msra.gmra.mrb[0].mxu1 %v423_v49  ;;  %v1683_v44 = vld [vmem:[%s2056_s3 + $0x220] sm:$0xff]   ;;  %v1685_v45 = vld [vmem:[%s2056_s3 + $0x230] sm:$0xff]  }
 0x110   : > { %v1923_v56 = vpop.permute.xlu0 %1591  ;;  %1486 = vmatpush3.bf16.msra.mxu1 %v1651_v47  ;;  %v380_v57 = vsel %vm340_vm6, %v1578_v53, %v1579_v52 }
 0x111   : > { %1466 = vmatpush3.bf16.msra.mxu0 %v1652_v50  ;;  %v1929_v59 = vpop.permute.xlu1 %1586  ;;  %1487 = vmatprep.subr.bf16.mxu1 %v1653_v51  ;;  %v426_v60 = vpack.c.bf16 %v381_v55, %v380_v57  ;;  %v1594_v28 = vunpack.i.h.bf16 %v1923_v56  ;;  %v1593_v29 = vunpack.i.l.bf16 %v1923_v56  ;;  %v1686_v50 = vld [vmem:[%s2056_s3 + $0x238] sm:$0xff]   ;;  %v1338_v55 = vld [vmem:[%s2057_s4] ss:$0 sm:$0xff] }
 0x112   : > { %1467 = vmatprep.subr.bf16.mxu0 %v1654_v54  ;;  %v1589_v30 = vunpack.i.h.bf16 %v1929_v59  ;;  %v1588_v31 = vunpack.i.l.bf16 %v1929_v59 }
 0x113   : > { %1127 = vmatprep.mubr.bf16.mxu0 %v426_v60  ;;  %v369_v35 = vsel %vm327_vm4, %v1593_v29, %v1594_v28 }
 0x114   : > { %v1602_v0 = vpop.permute.xlu0 %1601  ;;  %1488 = vmatpush3.bf16.msra.mxu1 %v1655_v58  ;;  %v368_v36 = vsel %vm327_vm4, %v1588_v31, %v1589_v30 }
 0x115   : > { %v1604_v1 = vunpack.i.h.bf16 %v1602_v0  ;;  %v1603_v2 = vunpack.i.l.bf16 %v1602_v0  ;;  %1468 = vmatpush3.bf16.msra.mxu0 %v1656_v61  ;;  %v1597_v4 = vpop.permute.xlu1 %1596  ;;  %1489 = vmatprep.subr.bf16.mxu1 %v1657_v62  ;;  %v425_v39 = vpack.c.bf16 %v369_v35, %v368_v36 }
 0x116   : > { %v1599_v7 = vunpack.i.h.bf16 %v1597_v4  ;;  %v1598_v8 = vunpack.i.l.bf16 %v1597_v4  ;;  %1469 = vmatprep.subr.bf16.mxu0 %v1658_v63 }
 0x117   : > { %v406_v10 = vsel %vm327_vm4, %v1603_v2, %v1604_v1 }
 0x118   : > { %1490 = vmatpush3.bf16.msra.mxu1 %v1659_v3  ;;  %v405_v14 = vsel %vm327_vm4, %v1598_v8, %v1599_v7  ;;  %v1612_v13 = vpop.permute.xlu0 %1611 }
 0x119   : > { %1470 = vmatpush3.bf16.msra.mxu0 %v1660_v5  ;;  %1491 = vmatprep.subr.bf16.mxu1 %v1661_v6  ;;  %v428_v15 = vpack.c.bf16 %v406_v10, %v405_v14  ;;  %v1614_v46 = vunpack.i.h.bf16 %v1612_v13  ;;  %v1613_v47 = vunpack.i.l.bf16 %v1612_v13 }
 0x11a   : > { %1471 = vmatprep.subr.bf16.mxu0 %v1662_v9 }
 0x11b   : > { %1168 = vmatprep.mubr.bf16.mxu1 %v428_v15  ;;  %v418_v51 = vsel %vm340_vm6, %v1613_v47, %v1614_v46 }
 0x11c   : > { %1492 = vmatpush3.bf16.msra.mxu1 %v1663_v12 }
 0x11d   : > { %1472 = vmatpush3.bf16.msra.mxu0 %v1664_v16  ;;  %1493 = vmatprep.subr.bf16.mxu1 %v1665_v17 }
 0x11e   : > { %1473 = vmatprep.subr.bf16.mxu0 %v1666_v19 }
 0x120   : > { %1494 = vmatpush3.bf16.msra.mxu1 %v1667_v20 }
 0x121   : > { %1474 = vmatpush3.bf16.msra.mxu0 %v1668_v21  ;;  %1495 = vmatprep.subr.bf16.mxu1 %v1669_v22 }
 0x122   : > { %1475 = vmatprep.subr.bf16.mxu0 %v1670_v23 }
 0x124   : > { %1496 = vmatpush3.bf16.msra.mxu1 %v1671_v24 }
 0x125   : > { %1476 = vmatpush3.bf16.msra.mxu0 %v1672_v25  ;;  %1497 = vmatprep.subr.bf16.mxu1 %v1673_v26 }
 0x126   : > { %1477 = vmatprep.subr.bf16.mxu0 %v1674_v27 }
 0x128   : > { %1498 = vmatpush3.bf16.msra.mxu1 %v1675_v32 }
 0x129   : > { %1478 = vmatpush3.bf16.msra.mxu0 %v1676_v33  ;;  %1499 = vmatprep.subr.bf16.mxu1 %v1677_v34 }
 0x12a   : > { %1516 = vmatprep.subr.bf16.mxu0 %v1699_v40 }
 0x12c   : > { %1128 = vmatmul.mubr.bf16.vlgmr.msra.gmra.mrb[4].mxu0 %v425_v39  ;;  %1500 = vmatpush3.bf16.msra.mxu1 %v1678_v37 }
 0x12d   : > { %1517 = vmatpush3.bf16.msra.mxu0 %v1679_v38  ;;  %1532 = vmatprep.mubr.msk.bf16.mxu0 %vm1700_vm9, %v1699_v40 }
 0x12e   : > { %1518 = vmatprep.subr.bf16.mxu0 %v1699_v40 }
 0x12f   : > { %1169 = vmatmul.mubr.bf16.vlgmr.msra.gmra.mrb[4].mxu1 %v427_v18  ;;  %v1607_v18 = vpop.permute.xlu1 %1606 }
 0x130   : > { %v1609_v48 = vunpack.i.h.bf16 %v1607_v18  ;;  %v1608_v49 = vunpack.i.l.bf16 %v1607_v18 }
 0x131   : > { %1519 = vmatpush3.bf16.msra.mxu0 %v1680_v41 }
 0x132   : > { %1520 = vmatprep.subr.bf16.mxu0 %v1699_v40  ;;  %v417_v52 = vsel %vm340_vm6, %v1608_v49, %v1609_v48 }
 0x133   : > { %v429_v53 = vpack.c.bf16 %v418_v51, %v417_v52 }
 0x135   : > { %1521 = vmatpush3.bf16.msra.mxu0 %v1681_v42 }
 0x136   : > { %1522 = vmatprep.subr.bf16.mxu0 %v1699_v40 }
 0x139   : > { %1523 = vmatpush3.bf16.msra.mxu0 %v1682_v43 }
 0x13a   : > { %1524 = vmatprep.subr.bf16.mxu0 %v1699_v40 }
 0x13d   : > { %1525 = vmatpush3.bf16.msra.mxu0 %v1683_v44 }
 0x13e   : > { %1526 = vmatprep.subr.bf16.mxu0 %v1699_v40 }
 0x141   : > { %1527 = vmatpush3.bf16.msra.mxu0 %v1684_v11 }
 0x142   : > { %1528 = vmatprep.subr.bf16.mxu0 %v1699_v40 }
 0x145   : > { %1529 = vmatpush3.bf16.msra.mxu0 %v1685_v45 }
 0x146   : > { %1530 = vmatprep.subr.bf16.mxu0 %v1699_v40 }
 0x149   : > { %1531 = vmatpush3.bf16.msra.mxu0 %v1686_v50 }
 0x14c   : > { %1533 = vmatmul.mubr.bf16.vlgmr.msra.gmra.mrb[8].mxu0 %v429_v53 }
 0x1df   : > { %v1435_v54 = vpop.f32.mrb[0].mxu0 }
 0x1e0   : > { %v1436_v56 = vpop.f32.mrb[1].mxu0 }
 0x1e1   : > { %v1437_v57 = vadd.f32 %v1436_v56, %v1435_v54  ;;  %v1438_v58 = vpop.f32.mrb[2].mxu0 }
 0x1e2   : > { %v1439_v59 = vpop.f32.mrb[3].mxu0  ;;  %v1457_v60 = vpop.f32.mrb[0].mxu1 }
 0x1e3   : > { %v1048_v61 = vadd.f32 %v1437_v57, %v1338_v55  ;;  %v1440_v62 = vadd.f32 %v1439_v59, %v1438_v58  ;;  %v1458_v63 = vpop.f32.mrb[1].mxu1 }
 0x1e4   : > { %v1459_v0 = vadd.f32 %v1458_v63, %v1457_v60  ;;  %v1460_v1 = vpop.f32.mrb[2].mxu1 }
 0x1e5   : > { %v1051_v2 = vadd.f32 %v1440_v62, %v1338_v55  ;;  %v1461_v3 = vpop.f32.mrb[3].mxu1 }
 0x1e6   : > { %v1089_v4 = vadd.f32 %v1459_v0, %v1048_v61  ;;  %v1462_v5 = vadd.f32 %v1461_v3, %v1460_v1 }
 0x1e8   : > { %v1092_v6 = vadd.f32 %v1462_v5, %v1051_v2 }
 0x1ff   : > { %v1479_v7 = vpop.f32.mrb[4].mxu0 }
 0x200   : > { %v1480_v8 = vpop.f32.mrb[5].mxu0 }
 0x201   : > { %v1481_v9 = vadd.f32 %v1480_v8, %v1479_v7  ;;  %v1482_v10 = vpop.f32.mrb[6].mxu0 }
 0x202   : > { %v1483_v12 = vpop.f32.mrb[7].mxu0  ;;  %v1501_v14 = vpop.f32.mrb[4].mxu1 }
 0x203   : > { %v1130_v15 = vadd.f32 %v1481_v9, %v1089_v4  ;;  %v1484_v16 = vadd.f32 %v1483_v12, %v1482_v10  ;;  %v1502_v17 = vpop.f32.mrb[5].mxu1 }
 0x204   : > { %v1503_v19 = vadd.f32 %v1502_v17, %v1501_v14  ;;  %v1504_v20 = vpop.f32.mrb[6].mxu1 }
 0x205   : > { %v1133_v21 = vadd.f32 %v1484_v16, %v1092_v6  ;;  %v1505_v22 = vpop.f32.mrb[7].mxu1 }
 0x206   : > { %v1506_v23 = vadd.f32 %v1505_v22, %v1504_v20  ;;  %v1171_v24 = vadd.f32 %v1503_v19, %v1130_v15 }
 0x208   : > { %v1174_v25 = vadd.f32 %v1506_v23, %v1133_v21 }
 0x21f   : > { %v1211_v26 = vpop.f32.mrb[8].mxu0 }
 0x220   : > { %v1212_v27 = vadd.f32 %v1211_v26, %v1171_v24  ;;  %v1534_v28 = vpop.f32.mrb[9].mxu0 }
 0x221   : > { %v1214_v29 = vpop.f32.mrb[10].mxu0 }
 0x222   : > { %v1218_v30 = vmax.f32 %v1212_v27, 0.0  ;;  %v1215_v31 = vadd.f32 %v1214_v29, %v1174_v25  ;;  %v1535_v32 = vpop.f32.mrb[11].mxu0 }
 0x224   : > { %1220 = vst [vmem:[%s258_s11] sm:$0xff] %v1218_v30  ;;  %v1219_v33 = vmax.f32 %v1215_v31, 0.0  ;;  %v1229_v34 = vmul.f32 %v1218_v30, %v1218_v30 }
 0x226   : > { %1221 = vst [vmem:[%s258_s11 + $0x8] sm:$0xff] %v1219_v33  ;;  %v1222_v35 = vadd.f32 %v1219_v33, %v1218_v30  ;;  %v1230_v36 = vmul.f32 %v1219_v33, %v1219_v33 }
 0x228   : > { %v1223_v37 = vrot.slane %v1222_v35, 4  ;;  %v1231_v38 = vadd.f32 %v1230_v36, %v1229_v34 }
 0x22a   : > { %v1224_v39 = vadd.f32 %v1223_v37, %v1222_v35  ;;  %v1232_v40 = vrot.slane %v1231_v38, 4 }
 0x22c   : > { %v1225_v41 = vrot.slane %v1224_v39, 2  ;;  %v1233_v42 = vadd.f32 %v1232_v40, %v1231_v38 }
 0x22e   : > { %v1226_v43 = vadd.f32 %v1225_v41, %v1224_v39  ;;  %v1234_v44 = vrot.slane %v1233_v42, 2 }
 0x230   : > { %v1227_v11 = vrot.slane %v1226_v43, 1  ;;  %v1235_v13 = vadd.f32 %v1234_v44, %v1233_v42 }
 0x232   : > { %v1236_v18 = vrot.slane %v1235_v13, 1  ;;  %v1228_v45 = vadd.f32 %v1227_v11, %v1226_v43 }
 0x234   : > { %v1237_v46 = vadd.f32 %v1236_v18, %v1235_v13 }
 0x236   : > { %v1238_v47 = vsel %vm301_vm1, %v1228_v45, %v1237_v46 }
 0x237   : > { %1239 = vst [vmem:[%s262_s14] sm:$0x3] %v1238_v47 }
 0x238 PF: > { %s17_s21 = sadd.s32 1, %s1693_s21  }
 0x239   : > { %p14_p4 = scmp.ge.s32.totalorder %s17_s21, 4  }
 0x23b   :  { %16 = sbr.rel (!%p14_p4) target bundleno = 1 (0x1), region = 82 }

// kernel: up_forward.5
= control target key start
LH: loop header
LB: loop body
LE: loop exit
PB: predicated region body
PF: predicated region fallthrough
CT: control target
= control target key end

     0   :  { %s275_s12 = smov 0   ;;  %s311_s0 = inlined_call_operand.vmem [shape: f32[2,16,128], index: 0, kind: input, shape index: {}]   ;;  %s312_s1 = inlined_call_operand.vmem [shape: f32[1,128], index: 1, kind: input, shape index: {}]   ;;  %s313_s2 = inlined_call_operand.vmem [shape: f32[1,128], index: 2, kind: input, shape index: {}]   ;;  %s314_s3 = inlined_call_operand.vmem [shape: f32[2,16,128], index: 3, kind: output, shape index: {}]  }
   0x1 LB: > { %s248_s13 = sadd.s32 4294967295, %s277_s12   ;;  %p252_p0 = scmp.ge.s32.totalorder %s277_s12, 1  ;;  %s277_s12 = sphi %s275_s12, %s13_s12  }
   0x2   : > { %p137_p1 = scmp.lt.s32.totalorder %s277_s12, 3 }
   0x4   : > { %p138_p2 = pnand %p252_p0, %p137_p1 }
   0x5   : > { %p161_p3 = scmp.lt.s32.totalorder (!%p138_p2), %s248_s13, 1  ;;  %v257_v0 = vld [vmem:[%s312_s1] ss:$0 sm:$0xff] (!%p138_p2) }
   0x6   : > { %141 = sbr.rel (%p138_p2) target bundleno = 22 (0x16), region = 32  ;;  %v258_v3 = vld [vmem:[%s313_s2] ss:$0 sm:$0xff] (!%p138_p2) }
   0xd   : > { %s316_s13 = smov (!%p161_p3, %s248_s13), 1 }
   0xe   : > { %s261_s14 = sshll.u32 %s316_s13, 4 }
   0xf   : > { %s165_s19 = scalar_lea.vmem %s311_s0, %s261_s14  ;;  %s170_s24 = scalar_lea.vmem %s314_s3, %s261_s14 }
  0x10   : > { %v171_v1 = vld [vmem:[%s165_s19] sm:$0xff]  ;;  %v172_v2 = vld [vmem:[%s165_s19 + $0x8] sm:$0xff] }
  0x11   : > { %v180_v4 = vmul.f32 %v257_v0, %v171_v1  ;;  %v181_v5 = vmul.f32 %v257_v0, %v172_v2 }
  0x13   : > { %v189_v6 = vadd.f32 %v258_v3, %v180_v4  ;;  %v190_v7 = vadd.f32 %v258_v3, %v181_v5 }
  0x15   : > { %191 = vst [vmem:[%s170_s24] sm:$0xff] %v189_v6  ;;  %192 = vst [vmem:[%s170_s24 + $0x8] sm:$0xff] %v190_v7 }
  0x16 PF: > { %s13_s12 = sadd.s32 1, %s277_s12  }
  0x17   : > { %p10_p4 = scmp.ge.s32.totalorder %s13_s12, 4  }
  0x19   :  { %12 = sbr.rel (!%p10_p4) target bundleno = 1 (0x1), region = 62 }

</bundles_post_ra>
